<compile_context>
chip_gen: v6e
topology: v6e:2x2x1
jax: 0.10.0
libtpu: 0.0.40
codegen_flags: <defaults>
</compile_context>

<pallas_src>
import functools

import numpy as np
import jax
import jax.numpy as jnp
from jax import lax
from jax.experimental import pallas as pl
from jax.experimental.pallas import tpu as pltpu


_NEG_BIG = -1e30  # finite "-inf" (avoids inf-inf NaN paths in the online max)


def _supcon_tiled_kernel(xr_ref, xc_ref, labr_ref, labc_ref, out_ref,
                         m_ref, l_ref, s_ref, p_ref, *,
                         inv_temperature, loss_scale, n_real, num_dims):
    # xr_ref  : (tm, Dp)        f32  row tile of L2-normalized features
    # xc_ref  : (tk, Dp)        f32  col tile of L2-normalized features
    # labr_ref: (tm, num_dims)  i32  row labels
    # labc_ref: (num_dims, tk)  i32  col labels
    # out_ref : (tm, 1)         f32  per-row loss (padded rows -> 0)
    # scratch : m,l = (tm,1) running max / sum-exp;
    #           s,p = (num_dims, tm, 1) masked sum(sim) / mask counts.
    i = pl.program_id(0)
    j = pl.program_id(1)
    tm = xr_ref.shape[0]
    tk = xc_ref.shape[0]

    @pl.when(j == 0)
    def _():
        m_ref[...] = jnp.full_like(m_ref, _NEG_BIG)
        l_ref[...] = jnp.zeros_like(l_ref)
        s_ref[...] = jnp.zeros_like(s_ref)
        p_ref[...] = jnp.zeros_like(p_ref)

    # Similarity tile on the MXU (f32 accumulate).
    sim = lax.dot_general(
        xr_ref[...], xc_ref[...],
        dimension_numbers=(((1,), (1,)), ((), ())),
        preferred_element_type=jnp.float32,
    ) * inv_temperature                                             # (tm, tk)

    # Tile-local global indices: diagonal & padding handling is O(tile).
    ri = i * tm + lax.broadcasted_iota(jnp.int32, (tm, 1), 0)       # (tm, 1)
    ci = j * tk + lax.broadcasted_iota(jnp.int32, (1, tk), 1)       # (1, tk)
    valid_col = ci < n_real                                         # (1, tk)
    keep = jnp.logical_and(valid_col, ri != ci)                     # (tm, tk)
    keep_f = keep.astype(jnp.float32)

    # Online max / sum-exp (max includes the diagonal, sum excludes it — same
    # as the reference: logits_max over the full row, exp_logits masked).
    m_tile = jnp.max(jnp.where(valid_col, sim, _NEG_BIG), axis=1, keepdims=True)
    m_old = m_ref[...]
    m_new = jnp.maximum(m_old, m_tile)
    e = jnp.where(keep, jnp.exp(sim - m_new), 0.0)
    l_ref[...] = l_ref[...] * jnp.exp(m_old - m_new) + jnp.sum(e, axis=1, keepdims=True)
    m_ref[...] = m_new

    # Masked sums — all label dimensions fused over one sim tile.
    lab_r = labr_ref[...]                                           # (tm, num_dims)
    lab_c = labc_ref[...]                                           # (num_dims, tk)
    for d in range(num_dims):
        pos = jnp.where(lab_r[:, d:d + 1] == lab_c[d:d + 1, :], keep_f, 0.0)
        s_ref[d] = s_ref[d] + jnp.sum(pos * sim, axis=1, keepdims=True)
        p_ref[d] = p_ref[d] + jnp.sum(pos, axis=1, keepdims=True)

    @pl.when(j == pl.num_programs(1) - 1)
    def _():
        # sum(mask*log_prob) = s - p * (max + log(sum_exp + 1e-12))
        lse = m_ref[...] + jnp.log(l_ref[...] + 1e-12)              # (tm, 1)
        acc = jnp.zeros((tm, 1), jnp.float32)
        for d in range(num_dims):
            s = s_ref[d]
            p = p_ref[d]
            acc = acc + (s - p * lse) * pl.reciprocal(p + 1e-12, approx=True)
        row_valid = (ri < n_real).astype(jnp.float32)
        out_ref[...] = (loss_scale * acc) * row_valid


def _round_up(x, m):
    return ((x + m - 1) // m) * m


def _supcon_pallas(contrast, lab_rows, n_real, temperature, base_temperature):
    """contrast: (n_real, D) L2-normalized f32; lab_rows: (n_real, num_dims) i32."""
    num_dims = int(lab_rows.shape[1])
    feat_dim = int(contrast.shape[1])

    n_pad = max(128, _round_up(n_real, 128))
    d_pad = max(128, _round_up(feat_dim, 128))

    # Zero-pad features (zero rows stay zero after normalization; zero cols are
    # free in the dot product).  Padded labels use a sentinel; padded rows/cols
    # are masked inside the kernel anyway.
    x = jnp.zeros((n_pad, d_pad), jnp.float32).at[:n_real, :feat_dim].set(contrast)
    lab_pad = jnp.full((n_pad, num_dims), np.iinfo(np.int32).min, jnp.int32)
    lab_pad = lab_pad.at[:n_real, :].set(lab_rows)
    lab_cols = lab_pad.T                                            # (num_dims, n_pad)

    # Tiles must divide n_pad (a multiple of 128); padding < 128 <= tk so the
    # first/last column tiles always contain valid columns.
    tm = 256 if n_pad % 256 == 0 else 128
    tk = 512 if n_pad % 512 == 0 else (256 if n_pad % 256 == 0 else 128)

    kernel = functools.partial(
        _supcon_tiled_kernel,
        inv_temperature=1.0 / float(temperature),
        loss_scale=-(float(temperature) / float(base_temperature)) / num_dims,
        n_real=n_real,
        num_dims=num_dims,
    )

    per_row = pl.pallas_call(
        kernel,
        out_shape=jax.ShapeDtypeStruct((n_pad, 1), jnp.float32),
        grid_spec=pltpu.PrefetchScalarGridSpec(
            num_scalar_prefetch=0,
            grid=(n_pad // tm, n_pad // tk),
            in_specs=[
                pl.BlockSpec((tm, d_pad), lambda i, j: (i, 0)),      # row features
                pl.BlockSpec((tk, d_pad), lambda i, j: (j, 0)),      # col features
                pl.BlockSpec((tm, num_dims), lambda i, j: (i, 0)),   # row labels
                pl.BlockSpec((num_dims, tk), lambda i, j: (0, j)),   # col labels
            ],
            out_specs=pl.BlockSpec((tm, 1), lambda i, j: (i, 0)),
            scratch_shapes=[
                pltpu.VMEM((tm, 1), jnp.float32),                    # running max
                pltpu.VMEM((tm, 1), jnp.float32),                    # running sum-exp
                pltpu.VMEM((num_dims, tm, 1), jnp.float32),          # sum(mask*sim)
                pltpu.VMEM((num_dims, tm, 1), jnp.float32),          # sum(mask)
            ],
        ),
        compiler_params=pltpu.CompilerParams(
            dimension_semantics=("parallel", "arbitrary")),
    )(x, x, lab_pad, lab_cols)

    return jnp.sum(per_row) / n_real


def supcon_loss(features, labels=None, temperature=0.07, base_temperature=0.07):
    """JAX/Pallas equivalent of SupConLoss.forward."""
    features = jnp.asarray(features, jnp.float32)
    if features.ndim < 3:
        features = features[:, None, :]
    if features.shape[1] > features.shape[2]:
        features = jnp.swapaxes(features, 1, 2)
    batch_size, n_views, feat_dim = features.shape
    n_real = batch_size * n_views

    # Hoisted L2 normalization (F.normalize, eps=1e-12): O(N*D) prologue.
    norm = jnp.sqrt(jnp.sum(features * features, axis=-1, keepdims=True))
    feats = features / jnp.maximum(norm, 1e-12)

    # torch.cat(torch.unbind(features, dim=1), dim=0): view-major concatenation.
    contrast = jnp.transpose(feats, (1, 0, 2)).reshape(n_real, feat_dim)

    if labels is None:
        # Unique label per row -> positives are only the (excluded) diagonal
        # -> loss == 0, exactly as the reference's mask = eye(total).
        lab_rows = jnp.arange(n_real, dtype=jnp.int32)[:, None]
    else:
        labels = jnp.asarray(labels)
        if labels.ndim == 1:
            labels = labels[:, None]
        # labels.repeat(1, n_views).flatten() == tile n_views times (view-major).
        lab_rows = jnp.tile(labels.astype(jnp.int32), (n_views, 1))  # (n_real, num_dims)

    return _supcon_pallas(contrast, lab_rows, n_real, temperature, base_temperature)


# ---------------------------------------------------------------------------
# Pure-numpy reference mirroring the PyTorch code (for correctness check).
# ---------------------------------------------------------------------------
def _supcon_ref(features, labels=None, temperature=0.07, base_temperature=0.07):
    f = np.asarray(features, np.float32)
    if f.ndim < 3:
        f = f[:, None, :]
    if f.shape[1] > f.shape[2]:
        f = np.swapaxes(f, 1, 2)
    b, v, _ = f.shape
    f = f / np.maximum(np.linalg.norm(f, axis=-1, keepdims=True), 1e-12)
    c = np.concatenate([f[:, i, :] for i in range(v)], axis=0)
    n = b * v
    adc = c @ c.T / temperature
    logits = adc - adc.max(axis=1, keepdims=True)
    lm = np.ones((n, n), np.float32)
    np.fill_diagonal(lm, 0.0)
    el = np.exp(logits) * lm
    lp = logits - np.log(el.sum(axis=1, keepdims=True) + 1e-12)

    def compute_loss(mask):
        mask = mask * lm
        mlpp = (mask * lp).sum(axis=1) / (mask.sum(axis=1) + 1e-12)
        return float((-(temperature / base_temperature) * mlpp).mean())

    if labels is None:
        return compute_loss(np.eye(n, dtype=np.float32))
    labels = np.asarray(labels)
    if labels.ndim == 1:
        lab = np.tile(labels, v)
        return compute_loss((lab[:, None] == lab[None, :]).astype(np.float32))
    out = 0.0
    for i in range(labels.shape[1]):
        lab = np.tile(labels[:, i], v)
        out += compute_loss((lab[:, None] == lab[None, :]).astype(np.float32))
    return out / labels.shape[1]


if __name__ == "__main__":
    key = jax.random.PRNGKey(0)
    k_feat, k_lab, k_lab2, k_feat2, k_lab3 = jax.random.split(key, 5)

    RTOL, ATOL = 1e-2, 1e-3   # headroom for approx reciprocal in the finalize

    # --- small case: single-tile path ---------------------------------------
    batch, n_views, feat_dim = 8, 2, 32
    features = jax.random.normal(k_feat, (batch, n_views, feat_dim), dtype=jnp.float32)
    labels_1d = jax.random.randint(k_lab, (batch,), 0, 4, dtype=jnp.int32)
    labels_2d = jax.random.randint(k_lab2, (batch, 3), 0, 3, dtype=jnp.int32)

    loss_1d = jax.block_until_ready(supcon_loss(features, labels_1d))
    ref_1d = _supcon_ref(np.asarray(features), np.asarray(labels_1d))
    assert np.allclose(float(loss_1d), ref_1d, rtol=RTOL, atol=ATOL), (float(loss_1d), ref_1d)

    loss_2d = jax.block_until_ready(supcon_loss(features, labels_2d))
    ref_2d = _supcon_ref(np.asarray(features), np.asarray(labels_2d))
    assert np.allclose(float(loss_2d), ref_2d, rtol=RTOL, atol=ATOL), (float(loss_2d), ref_2d)

    loss_none = jax.block_until_ready(supcon_loss(features, None))
    ref_none = _supcon_ref(np.asarray(features), None)
    assert np.allclose(float(loss_none), ref_none, rtol=RTOL, atol=ATOL), (float(loss_none), ref_none)

    # --- larger case: N=300 -> padded to 384, 3x3 grid, online LSE + padding --
    batch2, n_views2, feat_dim2 = 150, 2, 40
    features2 = jax.random.normal(k_feat2, (batch2, n_views2, feat_dim2), dtype=jnp.float32)
    labels_big = jax.random.randint(k_lab3, (batch2,), 0, 10, dtype=jnp.int32)
    loss_big = jax.block_until_ready(supcon_loss(features2, labels_big))
    ref_big = _supcon_ref(np.asarray(features2), np.asarray(labels_big))
    assert np.allclose(float(loss_big), ref_big, rtol=RTOL, atol=ATOL), (float(loss_big), ref_big)

    print("KERNEL_OK")
</pallas_src>

<mosaic_0001>
module attributes {stable_mosaic.version = 11 : i64} {
  func.func @_supcon_tiled_kernel(%arg0: i32, %arg1: i32, %arg2: memref<128x128xf32, #tpu.memory_space<vmem>>, %arg3: memref<128x128xf32, #tpu.memory_space<vmem>>, %arg4: memref<128x1xi32, #tpu.memory_space<vmem>>, %arg5: memref<1x128xi32, #tpu.memory_space<vmem>>, %arg6: memref<128x1xf32, #tpu.memory_space<vmem>>, %arg7: memref<128x1xf32, #tpu.memory_space<vmem>>, %arg8: memref<128x1xf32, #tpu.memory_space<vmem>>, %arg9: memref<1x128x1xf32, #tpu.memory_space<vmem>>, %arg10: memref<1x128x1xf32, #tpu.memory_space<vmem>>) attributes {dimension_semantics = [#tpu.dimension_semantics<parallel>, #tpu.dimension_semantics<arbitrary>], iteration_bounds = array<i64: 1, 1>, scalar_prefetch = 0 : i64, scratch_operands = 4 : i64, tpu.core_type = #tpu.core_type<tc>, window_params = [{transform_indices = @transform_0, window_bounds = array<i64: 128, 128>}, {transform_indices = @transform_1, window_bounds = array<i64: 128, 128>}, {transform_indices = @transform_2, window_bounds = array<i64: 128, 1>}, {transform_indices = @transform_3, window_bounds = array<i64: 1, 128>}, {transform_indices = @transform_4, window_bounds = array<i64: 128, 1>}]} {
    %c0_i32 = arith.constant 0 : i32
    %0 = arith.cmpi eq, %arg1, %c0_i32 : i32
    %1 = arith.extui %0 : i1 to i32
    %c0_i32_0 = arith.constant 0 : i32
    %2 = arith.cmpi ne, %1, %c0_i32_0 : i32
    scf.if %2 {
      %cst_39 = arith.constant -1.000000e+30 : f32
      %74 = vector.broadcast %cst_39 : f32 to vector<128x1xf32>
      %c0_40 = arith.constant 0 : index
      %c0_41 = arith.constant 0 : index
      %75 = vector.load %arg7[%c0_40, %c0_41] : memref<128x1xf32, #tpu.memory_space<vmem>>, vector<128x1xf32>
      tpu.vector_store %arg7[%c0_40, %c0_41], %74 {strides = array<i32>} : memref<128x1xf32, #tpu.memory_space<vmem>>, vector<128x1xf32>,
      %cst_42 = arith.constant 0.000000e+00 : f32
      %76 = vector.broadcast %cst_42 : f32 to vector<128x1xf32>
      %c0_43 = arith.constant 0 : index
      %c0_44 = arith.constant 0 : index
      %77 = vector.load %arg8[%c0_43, %c0_44] : memref<128x1xf32, #tpu.memory_space<vmem>>, vector<128x1xf32>
      tpu.vector_store %arg8[%c0_43, %c0_44], %76 {strides = array<i32>} : memref<128x1xf32, #tpu.memory_space<vmem>>, vector<128x1xf32>,
      %cst_45 = arith.constant 0.000000e+00 : f32
      %78 = vector.broadcast %cst_45 : f32 to vector<1x128x1xf32>
      %c0_46 = arith.constant 0 : index
      %c0_47 = arith.constant 0 : index
      %c0_48 = arith.constant 0 : index
      %79 = vector.load %arg9[%c0_46, %c0_47, %c0_48] : memref<1x128x1xf32, #tpu.memory_space<vmem>>, vector<1x128x1xf32>
      tpu.vector_store %arg9[%c0_46, %c0_47, %c0_48], %78 {strides = array<i32>} : memref<1x128x1xf32, #tpu.memory_space<vmem>>, vector<1x128x1xf32>,
      %cst_49 = arith.constant 0.000000e+00 : f32
      %80 = vector.broadcast %cst_49 : f32 to vector<1x128x1xf32>
      %c0_50 = arith.constant 0 : index
      %c0_51 = arith.constant 0 : index
      %c0_52 = arith.constant 0 : index
      %81 = vector.load %arg10[%c0_50, %c0_51, %c0_52] : memref<1x128x1xf32, #tpu.memory_space<vmem>>, vector<1x128x1xf32>
      tpu.vector_store %arg10[%c0_50, %c0_51, %c0_52], %80 {strides = array<i32>} : memref<1x128x1xf32, #tpu.memory_space<vmem>>, vector<1x128x1xf32>,
    } else {
    }
    %c0 = arith.constant 0 : index
    %c0_1 = arith.constant 0 : index
    %3 = vector.load %arg2[%c0, %c0_1] : memref<128x128xf32, #tpu.memory_space<vmem>>, vector<128x128xf32>
    %c0_2 = arith.constant 0 : index
    %c0_3 = arith.constant 0 : index
    %4 = vector.load %arg3[%c0_2, %c0_3] : memref<128x128xf32, #tpu.memory_space<vmem>>, vector<128x128xf32>
    %cst = arith.constant dense<0.000000e+00> : vector<128x128xf32>
    %5 = tpu.matmul %3, %4, %cst {dimension_numbers = #tpu.dot_dimension_numbers<[1], [1], [0], [0], [0, 0, 1, 0], [], []>} : vector<128x128xf32>, vector<128x128xf32>, vector<128x128xf32> -> vector<128x128xf32>
    %cst_4 = arith.constant 14.2857141 : f32
    %6 = vector.broadcast %cst_4 : f32 to vector<128x128xf32>
    %7 = arith.mulf %5, %6 : vector<128x128xf32>
    %c128_i32 = arith.constant 128 : i32
    %8 = arith.muli %arg0, %c128_i32 : i32
    %9 = tpu.iota {dimensions = array<i32: 0>} : vector<128x1xi32>
    %10 = vector.broadcast %8 : i32 to vector<128x1xi32>
    %11 = arith.addi %10, %9 : vector<128x1xi32>
    %c128_i32_5 = arith.constant 128 : i32
    %12 = arith.muli %arg1, %c128_i32_5 : i32
    %13 = tpu.iota {dimensions = array<i32: 1>} : vector<1x128xi32>
    %14 = vector.broadcast %12 : i32 to vector<1x128xi32>
    %15 = arith.addi %14, %13 : vector<1x128xi32>
    %c16_i32 = arith.constant 16 : i32
    %16 = vector.broadcast %c16_i32 : i32 to vector<1x128xi32>
    %17 = arith.cmpi slt, %15, %16 : vector<1x128xi32>
    %18 = vector.broadcast %11 : vector<128x1xi32> to vector<128x128xi32>
    %19 = vector.broadcast %15 : vector<1x128xi32> to vector<128x128xi32>
    %20 = arith.cmpi ne, %18, %19 : vector<128x128xi32>
    %21 = vector.broadcast %17 : vector<1x128xi1> to vector<128x128xi1>
    %22 = arith.andi %21, %20 : vector<128x128xi1>
    %23 = arith.extui %22 : vector<128x128xi1> to vector<128x128xi32>
    %24 = arith.sitofp %23 : vector<128x128xi32> to vector<128x128xf32>
    %cst_6 = arith.constant -1.000000e+30 : f32
    %25 = vector.shape_cast %17 : vector<1x128xi1> to vector<1x128xi1>
    %26 = vector.broadcast %25 : vector<1x128xi1> to vector<128x128xi1>
    %27 = vector.broadcast %cst_6 : f32 to vector<128x128xf32>
    %28 = arith.select %26, %7, %27 : vector<128x128xi1>, vector<128x128xf32>
    %cst_7 = arith.constant dense<0xFF800000> : vector<128xf32>
    %29 = vector.multi_reduction <maximumf>, %28, %cst_7 [1] : vector<128x128xf32> to vector<128xf32>
    %30 = vector.shape_cast %29 : vector<128xf32> to vector<128x1xf32>
    %c0_8 = arith.constant 0 : index
    %c0_9 = arith.constant 0 : index
    %31 = vector.load %arg7[%c0_8, %c0_9] : memref<128x1xf32, #tpu.memory_space<vmem>>, vector<128x1xf32>
    %32 = arith.maximumf %31, %30 : vector<128x1xf32>
    %33 = vector.broadcast %32 : vector<128x1xf32> to vector<128x128xf32>
    %34 = arith.subf %7, %33 : vector<128x128xf32>
    %35 = math.exp %34 : vector<128x128xf32>
    %cst_10 = arith.constant 0.000000e+00 : f32
    %36 = vector.broadcast %cst_10 : f32 to vector<128x128xf32>
    %37 = arith.select %22, %35, %36 : vector<128x128xi1>, vector<128x128xf32>
    %c0_11 = arith.constant 0 : index
    %c0_12 = arith.constant 0 : index
    %38 = vector.load %arg8[%c0_11, %c0_12] : memref<128x1xf32, #tpu.memory_space<vmem>>, vector<128x1xf32>
    %39 = arith.subf %31, %32 : vector<128x1xf32>
    %40 = math.exp %39 : vector<128x1xf32>
    %41 = arith.mulf %38, %40 : vector<128x1xf32>
    %cst_13 = arith.constant dense<0.000000e+00> : vector<128xf32>
    %42 = vector.multi_reduction <add>, %37, %cst_13 [1] : vector<128x128xf32> to vector<128xf32>
    %43 = vector.shape_cast %42 : vector<128xf32> to vector<128x1xf32>
    %44 = arith.addf %41, %43 : vector<128x1xf32>
    %c0_14 = arith.constant 0 : index
    %c0_15 = arith.constant 0 : index
    %45 = vector.load %arg8[%c0_14, %c0_15] : memref<128x1xf32, #tpu.memory_space<vmem>>, vector<128x1xf32>
    tpu.vector_store %arg8[%c0_14, %c0_15], %44 {strides = array<i32>} : memref<128x1xf32, #tpu.memory_space<vmem>>, vector<128x1xf32>,
    %c0_16 = arith.constant 0 : index
    %c0_17 = arith.constant 0 : index
    %46 = vector.load %arg7[%c0_16, %c0_17] : memref<128x1xf32, #tpu.memory_space<vmem>>, vector<128x1xf32>
    tpu.vector_store %arg7[%c0_16, %c0_17], %32 {strides = array<i32>} : memref<128x1xf32, #tpu.memory_space<vmem>>, vector<128x1xf32>,
    %c0_18 = arith.constant 0 : index
    %c0_19 = arith.constant 0 : index
    %47 = vector.load %arg4[%c0_18, %c0_19] : memref<128x1xi32, #tpu.memory_space<vmem>>, vector<128x1xi32>
    %c0_20 = arith.constant 0 : index
    %c0_21 = arith.constant 0 : index
    %48 = vector.load %arg5[%c0_20, %c0_21] : memref<1x128xi32, #tpu.memory_space<vmem>>, vector<1x128xi32>
    %49 = vector.broadcast %47 : vector<128x1xi32> to vector<128x128xi32>
    %50 = vector.broadcast %48 : vector<1x128xi32> to vector<128x128xi32>
    %51 = arith.cmpi eq, %49, %50 : vector<128x128xi32>
    %cst_22 = arith.constant 0.000000e+00 : f32
    %52 = vector.broadcast %cst_22 : f32 to vector<128x128xf32>
    %53 = arith.select %51, %24, %52 : vector<128x128xi1>, vector<128x128xf32>
    %c0_23 = arith.constant 0 : index
    %c0_24 = arith.constant 0 : index
    %c0_25 = arith.constant 0 : index
    %54 = vector.load %arg9[%c0_23, %c0_24, %c0_25] : memref<1x128x1xf32, #tpu.memory_space<vmem>>, vector<1x128x1xf32>
    %55 = vector.shape_cast %54 : vector<1x128x1xf32> to vector<128x1xf32>
    %56 = arith.mulf %53, %7 : vector<128x128xf32>
    %cst_26 = arith.constant dense<0.000000e+00> : vector<128xf32>
    %57 = vector.multi_reduction <add>, %56, %cst_26 [1] : vector<128x128xf32> to vector<128xf32>
    %58 = vector.shape_cast %57 : vector<128xf32> to vector<128x1xf32>
    %59 = arith.addf %55, %58 : vector<128x1xf32>
    %c0_27 = arith.constant 0 : index
    %c0_28 = arith.constant 0 : index
    %c0_29 = arith.constant 0 : index
    %60 = vector.load %arg9[%c0_27, %c0_28, %c0_29] : memref<1x128x1xf32, #tpu.memory_space<vmem>>, vector<1x128x1xf32>
    %61 = vector.shape_cast %60 : vector<1x128x1xf32> to vector<128x1xf32>
    %62 = vector.shape_cast %59 : vector<128x1xf32> to vector<1x128x1xf32>
    tpu.vector_store %arg9[%c0_27, %c0_28, %c0_29], %62 {strides = array<i32>} : memref<1x128x1xf32, #tpu.memory_space<vmem>>, vector<1x128x1xf32>,
    %c0_30 = arith.constant 0 : index
    %c0_31 = arith.constant 0 : index
    %c0_32 = arith.constant 0 : index
    %63 = vector.load %arg10[%c0_30, %c0_31, %c0_32] : memref<1x128x1xf32, #tpu.memory_space<vmem>>, vector<1x128x1xf32>
    %64 = vector.shape_cast %63 : vector<1x128x1xf32> to vector<128x1xf32>
    %cst_33 = arith.constant dense<0.000000e+00> : vector<128xf32>
    %65 = vector.multi_reduction <add>, %53, %cst_33 [1] : vector<128x128xf32> to vector<128xf32>
    %66 = vector.shape_cast %65 : vector<128xf32> to vector<128x1xf32>
    %67 = arith.addf %64, %66 : vector<128x1xf32>
    %c0_34 = arith.constant 0 : index
    %c0_35 = arith.constant 0 : index
    %c0_36 = arith.constant 0 : index
    %68 = vector.load %arg10[%c0_34, %c0_35, %c0_36] : memref<1x128x1xf32, #tpu.memory_space<vmem>>, vector<1x128x1xf32>
    %69 = vector.shape_cast %68 : vector<1x128x1xf32> to vector<128x1xf32>
    %70 = vector.shape_cast %67 : vector<128x1xf32> to vector<1x128x1xf32>
    tpu.vector_store %arg10[%c0_34, %c0_35, %c0_36], %70 {strides = array<i32>} : memref<1x128x1xf32, #tpu.memory_space<vmem>>, vector<1x128x1xf32>,
    %c0_i32_37 = arith.constant 0 : i32
    %71 = arith.cmpi eq, %arg1, %c0_i32_37 : i32
    %72 = arith.extui %71 : i1 to i32
    %c0_i32_38 = arith.constant 0 : i32
    %73 = arith.cmpi ne, %72, %c0_i32_38 : i32
    scf.if %73 {
      %c0_39 = arith.constant 0 : index
      %c0_40 = arith.constant 0 : index
      %74 = vector.load %arg7[%c0_39, %c0_40] : memref<128x1xf32, #tpu.memory_space<vmem>>, vector<128x1xf32>
      %c0_41 = arith.constant 0 : index
      %c0_42 = arith.constant 0 : index
      %75 = vector.load %arg8[%c0_41, %c0_42] : memref<128x1xf32, #tpu.memory_space<vmem>>, vector<128x1xf32>
      %cst_43 = arith.constant 9.99999996E-13 : f32
      %76 = vector.broadcast %cst_43 : f32 to vector<128x1xf32>
      %77 = arith.addf %75, %76 : vector<128x1xf32>
      %78 = math.log %77 : vector<128x1xf32>
      %79 = arith.addf %74, %78 : vector<128x1xf32>
      %cst_44 = arith.constant 0.000000e+00 : f32
      %80 = vector.broadcast %cst_44 : f32 to vector<128x1xf32>
      %c0_45 = arith.constant 0 : index
      %c0_46 = arith.constant 0 : index
      %c0_47 = arith.constant 0 : index
      %81 = vector.load %arg9[%c0_45, %c0_46, %c0_47] : memref<1x128x1xf32, #tpu.memory_space<vmem>>, vector<1x128x1xf32>
      %82 = vector.shape_cast %81 : vector<1x128x1xf32> to vector<128x1xf32>
      %c0_48 = arith.constant 0 : index
      %c0_49 = arith.constant 0 : index
      %c0_50 = arith.constant 0 : index
      %83 = vector.load %arg10[%c0_48, %c0_49, %c0_50] : memref<1x128x1xf32, #tpu.memory_space<vmem>>, vector<1x128x1xf32>
      %84 = vector.shape_cast %83 : vector<1x128x1xf32> to vector<128x1xf32>
      %85 = arith.mulf %84, %79 : vector<128x1xf32>
      %86 = arith.subf %82, %85 : vector<128x1xf32>
      %cst_51 = arith.constant 9.99999996E-13 : f32
      %87 = vector.broadcast %cst_51 : f32 to vector<128x1xf32>
      %88 = arith.addf %84, %87 : vector<128x1xf32>
      %89 = tpu.reciprocal %88 {approx = true} : vector<128x1xf32> -> vector<128x1xf32>
      %90 = arith.mulf %86, %89 : vector<128x1xf32>
      %91 = arith.addf %80, %90 : vector<128x1xf32>
      %c16_i32_52 = arith.constant 16 : i32
      %92 = vector.broadcast %c16_i32_52 : i32 to vector<128x1xi32>
      %93 = arith.cmpi slt, %11, %92 : vector<128x1xi32>
      %94 = arith.extui %93 : vector<128x1xi1> to vector<128x1xi32>
      %95 = arith.sitofp %94 : vector<128x1xi32> to vector<128x1xf32>
      %cst_53 = arith.constant -1.000000e+00 : f32
      %96 = vector.broadcast %cst_53 : f32 to vector<128x1xf32>
      %97 = arith.mulf %96, %91 : vector<128x1xf32>
      %98 = arith.mulf %97, %95 : vector<128x1xf32>
      %c0_54 = arith.constant 0 : index
      %c0_55 = arith.constant 0 : index
      %99 = vector.load %arg6[%c0_54, %c0_55] : memref<128x1xf32, #tpu.memory_space<vmem>>, vector<128x1xf32>
      tpu.vector_store %arg6[%c0_54, %c0_55], %98 {strides = array<i32>} : memref<128x1xf32, #tpu.memory_space<vmem>>, vector<128x1xf32>,
    } else {
    }
    return
  }
  func.func @transform_0(%arg0: i32, %arg1: i32) -> (i32, i32) {
    %c0_i32 = arith.constant 0 : i32
    %c0_i32_0 = arith.constant 0 : i32
    return %arg0, %c0_i32 : i32, i32
  }
  func.func @transform_1(%arg0: i32, %arg1: i32) -> (i32, i32) {
    %c0_i32 = arith.constant 0 : i32
    %c0_i32_0 = arith.constant 0 : i32
    return %arg1, %c0_i32 : i32, i32
  }
  func.func @transform_2(%arg0: i32, %arg1: i32) -> (i32, i32) {
    %c0_i32 = arith.constant 0 : i32
    %c0_i32_0 = arith.constant 0 : i32
    return %arg0, %c0_i32 : i32, i32
  }
  func.func @transform_3(%arg0: i32, %arg1: i32) -> (i32, i32) {
    %c0_i32 = arith.constant 0 : i32
    %c0_i32_0 = arith.constant 0 : i32
    return %c0_i32, %arg1 : i32, i32
  }
  func.func @transform_4(%arg0: i32, %arg1: i32) -> (i32, i32) {
    %c0_i32 = arith.constant 0 : i32
    %c0_i32_0 = arith.constant 0 : i32
    return %arg0, %c0_i32 : i32, i32
  }
}

</mosaic_0001>

<bundles_post_ra>
// kernel: tpu_custom_call.1
= control target key start
LH: loop header
LB: loop body
LE: loop exit
PB: predicated region body
PF: predicated region fallthrough
CT: control target
= control target key end

     0   :  { %9 = vsyncpa [#allocation7], 0  ;;  %s1685_s15 = smov [#allocation6]   ;;  %s2777_s0 = inlined_call_operand.vmem [shape: f32[128,128], index: 0, kind: input, shape index: {}]   ;;  %s2778_s1 = inlined_call_operand.hbm [shape: f32[128,128], index: 1, kind: input, shape index: {}]   ;;  %s2779_s2 = inlined_call_operand.vmem [shape: s32[128,1], index: 2, kind: input, shape index: {}]   ;;  %s2780_s3 = inlined_call_operand.vmem [shape: s32[1,128], index: 3, kind: input, shape index: {}]   ;;  %s2781_s4 = inlined_call_operand.vmem [shape: f32[128,1], index: 4, kind: output, shape index: {}]  }
   0x1   :  { %s17_s16 = sshll.u32 %s1685_s15, 4  ;;  %s18_s16 = int_to_ptr.vmem [resolvable:$true] %s17_s16 }
   0x2   :  { %s1671_s17 = scalar_lea.vmem %s18_s16, 2048  ;;  %p1676_p1 = scmp.lt.s32.totalorder %s18_s16, %s18_s16 }
   0x3   :  { %p1672_p0 = scmp.ne.s32.totalorder %s18_s16, %s1671_s17  ;;  %p1677_p2 = scmp.lt.s32.totalorder %s1671_s17, %s1671_s17 }
   0x5   :  { %p1678_p3 = por %p1677_p2, %p1676_p1 }
   0x7   :  { %p1679_p4 = pnand %p1678_p3, %p1672_p0 }
   0x9   :  { %1682 = shalt.err (!%p1679_p4)
}
   0xa   :  { %s1686_s18 = smov 128   ;;  %s1687_s19 = smov 8  }
   0xb   :  { %23 = dma.hbm_to_vmem [thread:$0]  %s2778_s1, 2048, %s18_s16, [#allocation7], %s1686_s18, %s1686_s18, %s1687_s19  }
   0xc   :  { %1683 = dma.done.wait [#allocation7], 2048  }
   0xd   :  { %1684 = vsyncadd [#allocation7], 4294965248  ;;  %v1688_v0 = vmov 0   ;;  %v131_v1 = vld [vmem:[#allocation6 + $0x78] sm:$0xff]  ;;  %v130_v2 = vld [vmem:[#allocation6 + $0x70] sm:$0xff]  ;;  %vm2801_vm0 = vcmask 7168   ;;  %v2784_v50 = vlaneseq }
   0xe   :  { %1534 = vset.pattern.permute.xlu0 %v1688_v0  ;;  %1533 = vset.pattern.permute.xlu1 %v1688_v0  ;;  %v129_v3 = vld [vmem:[#allocation6 + $0x68] sm:$0xff]  ;;  %v100_v4 = vld [vmem:[%s2777_s0] sm:$0xff]  ;;  %v788_v7 = vld [vmem:[%s2779_s2 + $0x18] sm:$0xff]  ;;  %v1689_v48 = vmov -1e+30   ;;  %v2782_v49 = vmov 0.0  }
   0xf   :  { %1439 = vmatprep.subr.mxu0 %v131_v1  ;;  %1495 = vmatprep.subr.mxu1 %v131_v1  ;;  %v108_v5 = vld [vmem:[%s2777_s0 + $0x40] sm:$0xff]  ;;  %v787_v8 = vld [vmem:[%s2779_s2 + $0x10] sm:$0xff]  ;;  %v127_v9 = vld [vmem:[#allocation6 + $0x58] sm:$0xff]  ;;  %45 = vst.msk [vmem:[#allocation2 + $0x48] sm:$0xff] %vm2801_vm0, %v1689_v48  ;;  %v1925_v51 = vand.u32 127, %v2784_v50 }
  0x10   :  { %1440 = vmatpush3.xpose.msra.mxu0 %v131_v1  ;;  %1511 = vmatpush3.xpose.msra.mxu1 %v131_v1  ;;  %v128_v6 = vld [vmem:[#allocation6 + $0x60] sm:$0xff]  ;;  %v791_v10 = vld [vmem:[%s2779_s2 + $0x30] sm:$0xff]  ;;  %v790_v14 = vld [vmem:[%s2779_s2 + $0x28] sm:$0xff]  ;;  %36 = vst.msk [vmem:[#allocation2] sm:$0xff] %vm2801_vm0, %v1689_v48 }
  0x11   :  { %1441 = vmatprep.subr.mxu0 %v130_v2  ;;  %1496 = vmatprep.subr.mxu1 %v130_v2  ;;  %v789_v11 = vld [vmem:[%s2779_s2 + $0x20] sm:$0xff]  ;;  %v126_v12 = vld [vmem:[#allocation6 + $0x50] sm:$0xff]  ;;  %v125_v15 = vld [vmem:[#allocation6 + $0x48] sm:$0xff]  ;;  %37 = vst.msk [vmem:[#allocation2 + $0x8] sm:$0xff] %vm2801_vm0, %v1689_v48  ;;  %vm333_vm1 = vcmp.lt.s32.totalorder %v1925_v51, 16 }
  0x12   :  { %1471 = vmatprep.mubr.f32.mxu0 %v100_v4  ;;  %1483 = vmatprep.mubr.f32.mxu1 %v108_v5  ;;  %v793_v13 = vld [vmem:[%s2779_s2 + $0x40] sm:$0xff]  ;;  %v795_v16 = vld [vmem:[%s2779_s2 + $0x50] sm:$0xff]  ;;  %v792_v17 = vld [vmem:[%s2779_s2 + $0x38] sm:$0xff]  ;;  %38 = vst.msk [vmem:[#allocation2 + $0x10] sm:$0xff] %vm2801_vm0, %v1689_v48 }
  0x13   :  { %812 = vperm.xlu0 %1534, %v788_v7   ;;  %809 = vperm.xlu1 %1533, %v787_v8   ;;  %v124_v18 = vld [vmem:[#allocation6 + $0x40] sm:$0xff]  ;;  %v794_v20 = vld [vmem:[%s2779_s2 + $0x48] sm:$0xff]  ;;  %v123_v21 = vld [vmem:[#allocation6 + $0x38] sm:$0xff]  ;;  %39 = vst.msk [vmem:[#allocation2 + $0x18] sm:$0xff] %vm2801_vm0, %v1689_v48 }
  0x14   :  { %1442 = vmatpush3.xpose.msra.mxu0 %v130_v2  ;;  %1512 = vmatpush3.xpose.msra.mxu1 %v130_v2  ;;  %v797_v19 = vld [vmem:[%s2779_s2 + $0x60] sm:$0xff]  ;;  %v799_v22 = vld [vmem:[%s2779_s2 + $0x70] sm:$0xff]  ;;  %v796_v23 = vld [vmem:[%s2779_s2 + $0x58] sm:$0xff]  ;;  %40 = vst.msk [vmem:[#allocation2 + $0x20] sm:$0xff] %vm2801_vm0, %v1689_v48 }
  0x15   :  { %1443 = vmatprep.subr.mxu0 %v129_v3  ;;  %1497 = vmatprep.subr.mxu1 %v129_v3  ;;  %v122_v24 = vld [vmem:[#allocation6 + $0x30] sm:$0xff]  ;;  %v785_v25 = vld [vmem:[%s2779_s2] sm:$0xff]  ;;  %v798_v26 = vld [vmem:[%s2779_s2 + $0x68] sm:$0xff]  ;;  %41 = vst.msk [vmem:[#allocation2 + $0x28] sm:$0xff] %vm2801_vm0, %v1689_v48 }
  0x16   :  { %v121_v27 = vld [vmem:[#allocation6 + $0x28] sm:$0xff]  ;;  %v800_v28 = vld [vmem:[%s2779_s2 + $0x78] sm:$0xff]  ;;  %v120_v29 = vld [vmem:[#allocation6 + $0x20] sm:$0xff]  ;;  %42 = vst.msk [vmem:[#allocation2 + $0x30] sm:$0xff] %vm2801_vm0, %v1689_v48 }
  0x17   :  { %821 = vperm.xlu0 %1534, %v791_v10   ;;  %815 = vperm.xlu1 %1533, %v789_v11   ;;  %v119_v30 = vld [vmem:[#allocation6 + $0x18] sm:$0xff]  ;;  %v118_v31 = vld [vmem:[#allocation6 + $0x10] sm:$0xff]  ;;  %v117_v32 = vld [vmem:[#allocation6 + $0x8] sm:$0xff]  ;;  %43 = vst.msk [vmem:[#allocation2 + $0x38] sm:$0xff] %vm2801_vm0, %v1689_v48 }
  0x18   :  { %1444 = vmatpush3.xpose.msra.mxu0 %v129_v3  ;;  %1513 = vmatpush3.xpose.msra.mxu1 %v129_v3  ;;  %v116_v33 = vld [vmem:[#allocation6] sm:$0xff]  ;;  %v101_v34 = vld [vmem:[%s2777_s0 + $0x8] sm:$0xff]  ;;  %v102_v36 = vld [vmem:[%s2777_s0 + $0x10] sm:$0xff]  ;;  %44 = vst.msk [vmem:[#allocation2 + $0x40] sm:$0xff] %vm2801_vm0, %v1689_v48 }
  0x19   :  { %1445 = vmatprep.subr.mxu0 %v128_v6  ;;  %1498 = vmatprep.subr.mxu1 %v128_v6  ;;  %v109_v35 = vld [vmem:[%s2777_s0 + $0x48] sm:$0xff]  ;;  %v110_v37 = vld [vmem:[%s2777_s0 + $0x50] sm:$0xff]  ;;  %v103_v38 = vld [vmem:[%s2777_s0 + $0x18] sm:$0xff]  ;;  %46 = vst.msk [vmem:[#allocation2 + $0x50] sm:$0xff] %vm2801_vm0, %v1689_v48 }
  0x1a   :  { %v111_v39 = vld [vmem:[%s2777_s0 + $0x58] sm:$0xff]  ;;  %v104_v40 = vld [vmem:[%s2777_s0 + $0x20] sm:$0xff]  ;;  %v105_v42 = vld [vmem:[%s2777_s0 + $0x28] sm:$0xff]  ;;  %47 = vst.msk [vmem:[#allocation2 + $0x58] sm:$0xff] %vm2801_vm0, %v1689_v48 }
  0x1b   :  { %827 = vperm.xlu0 %1534, %v793_v13   ;;  %818 = vperm.xlu1 %1533, %v790_v14   ;;  %v112_v41 = vld [vmem:[%s2777_s0 + $0x60] sm:$0xff]  ;;  %v113_v43 = vld [vmem:[%s2777_s0 + $0x68] sm:$0xff]  ;;  %v106_v44 = vld [vmem:[%s2777_s0 + $0x30] sm:$0xff]  ;;  %48 = vst.msk [vmem:[#allocation2 + $0x60] sm:$0xff] %vm2801_vm0, %v1689_v48 }
  0x1c   :  { %1446 = vmatpush3.xpose.msra.mxu0 %v128_v6  ;;  %1514 = vmatpush3.xpose.msra.mxu1 %v128_v6  ;;  %v114_v45 = vld [vmem:[%s2777_s0 + $0x70] sm:$0xff]  ;;  %v107_v46 = vld [vmem:[%s2777_s0 + $0x38] sm:$0xff]  ;;  %49 = vst.msk [vmem:[#allocation2 + $0x68] sm:$0xff] %vm2801_vm0, %v1689_v48  ;;  %50 = vst.msk [vmem:[#allocation2 + $0x70] sm:$0xff] %vm2801_vm0, %v1689_v48 }
  0x1d   :  { %1447 = vmatprep.subr.mxu0 %v127_v9  ;;  %1499 = vmatprep.subr.mxu1 %v127_v9  ;;  %v115_v47 = vld [vmem:[%s2777_s0 + $0x78] sm:$0xff]  ;;  %51 = vst.msk [vmem:[#allocation2 + $0x78] sm:$0xff] %vm2801_vm0, %v1689_v48  ;;  %52 = vst.msk [vmem:[#allocation3] sm:$0xff] %vm2801_vm0, %v2782_v49 }
  0x1e   :  { %53 = vst.msk [vmem:[#allocation3 + $0x8] sm:$0xff] %vm2801_vm0, %v2782_v49  ;;  %54 = vst.msk [vmem:[#allocation3 + $0x10] sm:$0xff] %vm2801_vm0, %v2782_v49 }
  0x1f   :  { %833 = vperm.xlu0 %1534, %v795_v16   ;;  %824 = vperm.xlu1 %1533, %v792_v17   ;;  %55 = vst.msk [vmem:[#allocation3 + $0x18] sm:$0xff] %vm2801_vm0, %v2782_v49  ;;  %56 = vst.msk [vmem:[#allocation3 + $0x20] sm:$0xff] %vm2801_vm0, %v2782_v49 }
  0x20   :  { %1448 = vmatpush3.xpose.msra.mxu0 %v127_v9  ;;  %1515 = vmatpush3.xpose.msra.mxu1 %v127_v9  ;;  %57 = vst.msk [vmem:[#allocation3 + $0x28] sm:$0xff] %vm2801_vm0, %v2782_v49  ;;  %58 = vst.msk [vmem:[#allocation3 + $0x30] sm:$0xff] %vm2801_vm0, %v2782_v49 }
  0x21   :  { %1449 = vmatprep.subr.mxu0 %v126_v12  ;;  %1500 = vmatprep.subr.mxu1 %v126_v12  ;;  %59 = vst.msk [vmem:[#allocation3 + $0x38] sm:$0xff] %vm2801_vm0, %v2782_v49  ;;  %60 = vst.msk [vmem:[#allocation3 + $0x40] sm:$0xff] %vm2801_vm0, %v2782_v49 }
  0x22   :  { %61 = vst.msk [vmem:[#allocation3 + $0x48] sm:$0xff] %vm2801_vm0, %v2782_v49  ;;  %62 = vst.msk [vmem:[#allocation3 + $0x50] sm:$0xff] %vm2801_vm0, %v2782_v49 }
  0x23   :  { %839 = vperm.xlu0 %1534, %v797_v19   ;;  %830 = vperm.xlu1 %1533, %v794_v20   ;;  %63 = vst.msk [vmem:[#allocation3 + $0x58] sm:$0xff] %vm2801_vm0, %v2782_v49  ;;  %64 = vst.msk [vmem:[#allocation3 + $0x60] sm:$0xff] %vm2801_vm0, %v2782_v49 }
  0x24   :  { %1450 = vmatpush3.xpose.msra.mxu0 %v126_v12  ;;  %1516 = vmatpush3.xpose.msra.mxu1 %v126_v12  ;;  %65 = vst.msk [vmem:[#allocation3 + $0x68] sm:$0xff] %vm2801_vm0, %v2782_v49  ;;  %66 = vst.msk [vmem:[#allocation3 + $0x70] sm:$0xff] %vm2801_vm0, %v2782_v49 }
  0x25   :  { %1451 = vmatprep.subr.mxu0 %v125_v15  ;;  %1501 = vmatprep.subr.mxu1 %v125_v15  ;;  %67 = vst.msk [vmem:[#allocation3 + $0x78] sm:$0xff] %vm2801_vm0, %v2782_v49  ;;  %68 = vst.msk [vmem:[#allocation4] sm:$0xff] %vm2801_vm0, %v2782_v49 }
  0x26   :  { %69 = vst.msk [vmem:[#allocation4 + $0x8] sm:$0xff] %vm2801_vm0, %v2782_v49  ;;  %70 = vst.msk [vmem:[#allocation4 + $0x10] sm:$0xff] %vm2801_vm0, %v2782_v49 }
  0x27   :  { %845 = vperm.xlu0 %1534, %v799_v22   ;;  %836 = vperm.xlu1 %1533, %v796_v23   ;;  %71 = vst.msk [vmem:[#allocation4 + $0x18] sm:$0xff] %vm2801_vm0, %v2782_v49  ;;  %72 = vst.msk [vmem:[#allocation4 + $0x20] sm:$0xff] %vm2801_vm0, %v2782_v49 }
  0x28   :  { %1452 = vmatpush3.xpose.msra.mxu0 %v125_v15  ;;  %1517 = vmatpush3.xpose.msra.mxu1 %v125_v15  ;;  %73 = vst.msk [vmem:[#allocation4 + $0x28] sm:$0xff] %vm2801_vm0, %v2782_v49  ;;  %74 = vst.msk [vmem:[#allocation4 + $0x30] sm:$0xff] %vm2801_vm0, %v2782_v49 }
  0x29   :  { %1453 = vmatprep.subr.mxu0 %v124_v18  ;;  %1502 = vmatprep.subr.mxu1 %v124_v18  ;;  %75 = vst.msk [vmem:[#allocation4 + $0x38] sm:$0xff] %vm2801_vm0, %v2782_v49  ;;  %76 = vst.msk [vmem:[#allocation4 + $0x40] sm:$0xff] %vm2801_vm0, %v2782_v49 }
  0x2a   :  { %77 = vst.msk [vmem:[#allocation4 + $0x48] sm:$0xff] %vm2801_vm0, %v2782_v49  ;;  %78 = vst.msk [vmem:[#allocation4 + $0x50] sm:$0xff] %vm2801_vm0, %v2782_v49 }
  0x2b   :  { %803 = vperm.xlu0 %1534, %v785_v25   ;;  %842 = vperm.xlu1 %1533, %v798_v26   ;;  %79 = vst.msk [vmem:[#allocation4 + $0x58] sm:$0xff] %vm2801_vm0, %v2782_v49  ;;  %80 = vst.msk [vmem:[#allocation4 + $0x60] sm:$0xff] %vm2801_vm0, %v2782_v49 }
  0x2c   :  { %1454 = vmatpush3.xpose.msra.mxu0 %v124_v18  ;;  %1518 = vmatpush3.xpose.msra.mxu1 %v124_v18  ;;  %81 = vst.msk [vmem:[#allocation4 + $0x68] sm:$0xff] %vm2801_vm0, %v2782_v49  ;;  %82 = vst.msk [vmem:[#allocation4 + $0x70] sm:$0xff] %vm2801_vm0, %v2782_v49 }
  0x2d   :  { %1455 = vmatprep.subr.mxu0 %v123_v21  ;;  %1503 = vmatprep.subr.mxu1 %v123_v21  ;;  %83 = vst.msk [vmem:[#allocation4 + $0x78] sm:$0xff] %vm2801_vm0, %v2782_v49  ;;  %84 = vst.msk [vmem:[#allocation5] sm:$0xff] %vm2801_vm0, %v2782_v49 }
  0x2e   :  { %85 = vst.msk [vmem:[#allocation5 + $0x8] sm:$0xff] %vm2801_vm0, %v2782_v49  ;;  %86 = vst.msk [vmem:[#allocation5 + $0x10] sm:$0xff] %vm2801_vm0, %v2782_v49 }
  0x2f   :  { %848 = vperm.xlu1 %1533, %v800_v28   ;;  %87 = vst.msk [vmem:[#allocation5 + $0x18] sm:$0xff] %vm2801_vm0, %v2782_v49  ;;  %88 = vst.msk [vmem:[#allocation5 + $0x20] sm:$0xff] %vm2801_vm0, %v2782_v49 }
  0x30   :  { %1456 = vmatpush3.xpose.msra.mxu0 %v123_v21  ;;  %1519 = vmatpush3.xpose.msra.mxu1 %v123_v21  ;;  %89 = vst.msk [vmem:[#allocation5 + $0x28] sm:$0xff] %vm2801_vm0, %v2782_v49  ;;  %90 = vst.msk [vmem:[#allocation5 + $0x30] sm:$0xff] %vm2801_vm0, %v2782_v49 }
  0x31   :  { %1457 = vmatprep.subr.mxu0 %v122_v24  ;;  %1504 = vmatprep.subr.mxu1 %v122_v24  ;;  %91 = vst.msk [vmem:[#allocation5 + $0x38] sm:$0xff] %vm2801_vm0, %v2782_v49  ;;  %92 = vst.msk [vmem:[#allocation5 + $0x40] sm:$0xff] %vm2801_vm0, %v2782_v49 }
  0x32   :  { %93 = vst.msk [vmem:[#allocation5 + $0x48] sm:$0xff] %vm2801_vm0, %v2782_v49  ;;  %94 = vst.msk [vmem:[#allocation5 + $0x50] sm:$0xff] %vm2801_vm0, %v2782_v49 }
  0x33   :  { %95 = vst.msk [vmem:[#allocation5 + $0x58] sm:$0xff] %vm2801_vm0, %v2782_v49  ;;  %96 = vst.msk [vmem:[#allocation5 + $0x60] sm:$0xff] %vm2801_vm0, %v2782_v49 }
  0x34   :  { %1458 = vmatpush3.xpose.msra.mxu0 %v122_v24  ;;  %1520 = vmatpush3.xpose.msra.mxu1 %v122_v24  ;;  %97 = vst.msk [vmem:[#allocation5 + $0x68] sm:$0xff] %vm2801_vm0, %v2782_v49  ;;  %98 = vst.msk [vmem:[#allocation5 + $0x70] sm:$0xff] %vm2801_vm0, %v2782_v49 }
  0x35   :  { %1459 = vmatprep.subr.mxu0 %v121_v27  ;;  %1505 = vmatprep.subr.mxu1 %v121_v27  ;;  %99 = vst.msk [vmem:[#allocation5 + $0x78] sm:$0xff] %vm2801_vm0, %v2782_v49  ;;  %v2162_v49 = vld [vmem:[#allocation2 + $0x78] sm:$0xff] }
  0x36   :  { %2849 = vst [vmem:[#allocation36_spill] sm:$0xff] %v2162_v49 }
  0x38   :  { %1460 = vmatpush3.xpose.msra.mxu0 %v121_v27  ;;  %1521 = vmatpush3.xpose.msra.mxu1 %v121_v27 }
  0x39   :  { %1461 = vmatprep.subr.mxu0 %v120_v29  ;;  %1506 = vmatprep.subr.mxu1 %v120_v29 }
  0x3c   :  { %1462 = vmatpush3.xpose.msra.mxu0 %v120_v29  ;;  %1522 = vmatpush3.xpose.msra.mxu1 %v120_v29 }
  0x3d   :  { %1463 = vmatprep.subr.mxu0 %v119_v30  ;;  %1507 = vmatprep.subr.mxu1 %v119_v30 }
  0x40   :  { %1464 = vmatpush3.xpose.msra.mxu0 %v119_v30  ;;  %1523 = vmatpush3.xpose.msra.mxu1 %v119_v30 }
  0x41   :  { %1465 = vmatprep.subr.mxu0 %v118_v31  ;;  %1508 = vmatprep.subr.mxu1 %v118_v31 }
  0x44   :  { %1466 = vmatpush3.xpose.msra.mxu0 %v118_v31  ;;  %1524 = vmatpush3.xpose.msra.mxu1 %v118_v31 }
  0x45   :  { %1467 = vmatprep.subr.mxu0 %v117_v32  ;;  %1509 = vmatprep.subr.mxu1 %v117_v32 }
  0x48   :  { %1468 = vmatpush3.xpose.msra.mxu0 %v117_v32  ;;  %1525 = vmatpush3.xpose.msra.mxu1 %v117_v32 }
  0x49   :  { %1469 = vmatprep.subr.mxu0 %v116_v33  ;;  %1510 = vmatprep.subr.mxu1 %v116_v33 }
  0x4c   :  { %1470 = vmatpush3.xpose.msra.mxu0 %v116_v33  ;;  %1526 = vmatpush3.xpose.msra.mxu1 %v116_v33 }
  0x4f   :  { %1472 = vmatmul.mubr.f32.vlgmr.msra.gmra.mxu0 %v101_v34  ;;  %1484 = vmatmul.mubr.f32.vlgmr.msra.gmra.mxu1 %v109_v35 }
  0x50   :  { %1474 = vmatprep.mubr.f32.mxu0 %v102_v36  ;;  %1486 = vmatprep.mubr.f32.mxu1 %v110_v37 }
  0x53   :  { %1475 = vmatmul.mubr.f32.gmra.mxu0 %v103_v38  ;;  %1487 = vmatmul.mubr.f32.gmra.mxu1 %v111_v39 }
  0x54   :  { %1477 = vmatprep.mubr.f32.mxu0 %v104_v40  ;;  %1489 = vmatprep.mubr.f32.mxu1 %v112_v41 }
  0x57   :  { %1478 = vmatmul.mubr.f32.gmra.mxu0 %v105_v42  ;;  %1490 = vmatmul.mubr.f32.gmra.mxu1 %v113_v43 }
  0x58   :  { %1480 = vmatprep.mubr.f32.mxu0 %v106_v44  ;;  %1492 = vmatprep.mubr.f32.mxu1 %v114_v45 }
  0x5b   :  { %1481 = vmatmul.mubr.f32.gmra.mxu0 %v107_v46  ;;  %1493 = vmatmul.mubr.f32.gmra.mxu1 %v115_v47 }
  0x8e   :  { %v2008_v36 = vpop.permute.xlu1 %809  ;;  %v2010_v37 = vpop.permute.xlu0 %812 }
  0x92   :  { %v2012_v38 = vpop.permute.xlu1 %815  ;;  %v2014_v39 = vpop.permute.xlu0 %821 }
  0x96   :  { %v2016_v40 = vpop.permute.xlu1 %818  ;;  %v2018_v41 = vpop.permute.xlu0 %827 }
  0x9a   :  { %v2020_v42 = vpop.permute.xlu1 %824  ;;  %v2022_v43 = vpop.permute.xlu0 %833 }
  0x9e   :  { %v2024_v44 = vpop.permute.xlu1 %830  ;;  %v2026_v45 = vpop.permute.xlu0 %839 }
  0xa2   :  { %v2028_v46 = vpop.permute.xlu1 %836  ;;  %v2030_v47 = vpop.permute.xlu0 %845 }
  0xa6   :  { %v2032_v48 = vpop.permute.xlu1 %842 }
 0x10f   :  { %v1473_v52 = vpop.f32.mrf.mxu0  ;;  %v1485_v53 = vpop.f32.mrf.mxu1 }
 0x110   :  { %v1928_v54 = vmul.f32 14.285714, %v1473_v52  ;;  %v1930_v55 = vmul.f32 14.285714, %v1485_v53  ;;  %v2034_v52 = vpop.permute.xlu1 %848  ;;  %v2036_v53 = vpop.permute.xlu0 %803 }
 0x111   :  { %v198_v56 = vpop.f32.mrf.mxu0  ;;  %v238_v57 = vpop.f32.mrf.mxu1 }
 0x112   :  { %v409_v58 = vsel %vm333_vm1, %v1930_v55, -1e+30  ;;  %v1935_v59 = vmul.f32 14.285714, %v198_v56  ;;  %v401_v60 = vsel %vm333_vm1, %v1928_v54, -1e+30 }
 0x113   :  { %434 = vmax.xlane.f32.xlu1 %v409_v58  ;;  %v1476_v61 = vpop.f32.mrf.mxu0  ;;  %v1488_v62 = vpop.f32.mrf.mxu1  ;;  %418 = vmax.xlane.f32.xlu0 %v401_v60  ;;  %v1947_v3 = vmul.f32 14.285714, %v238_v57  ;;  %v2038_v56 = vld [vmem:[#allocation2 + $0x48] sm:$0xff] }
 0x114   :  { %v1940_v63 = vmul.f32 14.285714, %v1476_v61  ;;  %v1942_v0 = vmul.f32 14.285714, %v1488_v62  ;;  %v400_v4 = vsel %vm333_vm1, %v1935_v59, -1e+30 }
 0x115   :  { %v248_v2 = vpop.f32.mrf.mxu1  ;;  %v208_v5 = vpop.f32.mrf.mxu0  ;;  %v408_v10 = vsel %vm333_vm1, %v1947_v3, -1e+30  ;;  %2822 = vst [vmem:[#allocation9_spill] sm:$0xff] %v2038_v56  ;;  %v2040_v57 = vld [vmem:[#allocation2 + $0x8] sm:$0xff] }
 0x116   :  { %v403_v1 = vsel %vm333_vm1, %v1940_v63, -1e+30  ;;  %v411_v6 = vsel %vm333_vm1, %v1942_v0, -1e+30  ;;  %v1955_v7 = vmul.f32 14.285714, %v248_v2 }
 0x117   :  { %422 = vmax.xlane.f32.xlu1 %v403_v1  ;;  %416 = vmax.xlane.f32.xlu0 %v400_v4  ;;  %v1479_v8 = vpop.f32.mrf.mxu0  ;;  %v1957_v9 = vmul.f32 14.285714, %v208_v5  ;;  %v1491_v14 = vpop.f32.mrf.mxu1  ;;  %2823 = vst [vmem:[#allocation10_spill] sm:$0xff] %v2040_v57  ;;  %v2048_v1 = vld [vmem:[#allocation2 + $0x18] sm:$0xff]  ;;  %v2055_v4 = vld [vmem:[#allocation2] sm:$0xff] }
 0x118   :  { %v1962_v11 = vmul.f32 14.285714, %v1479_v8  ;;  %v410_v13 = vsel %vm333_vm1, %v1955_v7, -1e+30  ;;  %v1972_v17 = vmul.f32 14.285714, %v1491_v14 }
 0x119   :  { %v218_v12 = vpop.f32.mrf.mxu0  ;;  %v402_v16 = vsel %vm333_vm1, %v1957_v9, -1e+30  ;;  %v258_v20 = vpop.f32.mrf.mxu1  ;;  %2826 = vst [vmem:[#allocation13_spill] sm:$0xff] %v2048_v1  ;;  %2827 = vst [vmem:[#allocation14_spill] sm:$0xff] %v2055_v4 }
 0x11a   :  { %v1967_v15 = vmul.f32 14.285714, %v218_v12  ;;  %v405_v18 = vsel %vm333_vm1, %v1962_v11, -1e+30  ;;  %v1977_v21 = vmul.f32 14.285714, %v258_v20 }
 0x11b   :  { %438 = vmax.xlane.f32.xlu1 %v411_v6  ;;  %432 = vmax.xlane.f32.xlu0 %v408_v10  ;;  %v1482_v19 = vpop.f32.mrf.mxu0  ;;  %v413_v24 = vsel %vm333_vm1, %v1972_v17, -1e+30  ;;  %v1494_v26 = vpop.f32.mrf.mxu1 }
 0x11c   :  { %v404_v22 = vsel %vm333_vm1, %v1967_v15, -1e+30  ;;  %v1985_v25 = vmul.f32 14.285714, %v1482_v19  ;;  %v412_v27 = vsel %vm333_vm1, %v1977_v21, -1e+30 }
 0x11d   :  { %v228_v23 = vpop.f32.mrf.mxu0  ;;  %v268_v29 = vpop.f32.mrf.mxu1  ;;  %v1992_v30 = vmul.f32 14.285714, %v1494_v26 }
 0x11e   :  { %v1990_v28 = vmul.f32 14.285714, %v228_v23  ;;  %v407_v31 = vsel %vm333_vm1, %v1985_v25, -1e+30  ;;  %v2000_v33 = vmul.f32 14.285714, %v268_v29 }
 0x11f   :  { %420 = vmax.xlane.f32.xlu1 %v402_v16  ;;  %436 = vmax.xlane.f32.xlu0 %v410_v13  ;;  %v415_v34 = vsel %vm333_vm1, %v1992_v30, -1e+30  ;;  %v2068_v13 = vld [vmem:[#allocation2 + $0x58] sm:$0xff]  ;;  %v2074_v16 = vld [vmem:[#allocation2 + $0x40] sm:$0xff] }
 0x120   :  { %v406_v32 = vsel %vm333_vm1, %v1990_v28, -1e+30  ;;  %v414_v35 = vsel %vm333_vm1, %v2000_v33, -1e+30  ;;  %2830 = vst [vmem:[#allocation17_spill] sm:$0xff] %v2068_v13  ;;  %2831 = vst [vmem:[#allocation18_spill] sm:$0xff] %v2074_v16 }
 0x123   :  { %426 = vmax.xlane.f32.xlu1 %v405_v18  ;;  %424 = vmax.xlane.f32.xlu0 %v404_v22  ;;  %v2132_v18 = vld [vmem:[#allocation2 + $0x60] sm:$0xff] }
 0x124   :  { %2843 = vst [vmem:[#allocation30_spill] sm:$0xff] %v2132_v18 }
 0x127   :  { %442 = vmax.xlane.f32.xlu1 %v413_v24  ;;  %440 = vmax.xlane.f32.xlu0 %v412_v27  ;;  %v2087_v24 = vld [vmem:[#allocation2 + $0x10] sm:$0xff] }
 0x128   :  { %2834 = vst [vmem:[#allocation21_spill] sm:$0xff] %v2087_v24  ;;  %v2093_v27 = vld [vmem:[#allocation2 + $0x50] sm:$0xff] }
 0x129   :  { %2835 = vst [vmem:[#allocation22_spill] sm:$0xff] %v2093_v27 }
 0x12b   :  { %430 = vmax.xlane.f32.xlu1 %v407_v31  ;;  %428 = vmax.xlane.f32.xlu0 %v406_v32 }
 0x12f   :  { %446 = vmax.xlane.f32.xlu1 %v415_v34  ;;  %444 = vmax.xlane.f32.xlu0 %v414_v35 }
 0x19c   :  { %v435_v58 = vpop.xlane.xlu1 %434  ;;  %v419_v61 = vpop.xlane.xlu0 %418 }
 0x19d   :  { %v2043_v60 = vmax.f32 %v2038_v56, %v435_v58  ;;  %v2046_v62 = vmax.f32 %v2040_v57, %v419_v61  ;;  %v2107_v58 = vld [vmem:[#allocation2 + $0x28] sm:$0xff]  ;;  %v2142_v61 = vld [vmem:[#allocation2 + $0x38] sm:$0xff] }
 0x19e   :  { %2838 = vst [vmem:[#allocation25_spill] sm:$0xff] %v2107_v58  ;;  %2845 = vst [vmem:[#allocation32_spill] sm:$0xff] %v2142_v61 }
 0x19f   :  { %2824 = vst [vmem:[#allocation11_spill] sm:$0xff] %v2043_v60  ;;  %2825 = vst [vmem:[#allocation12_spill] sm:$0xff] %v2046_v62  ;;  %527 = vperm.xlu0 %1534, %v2043_v60   ;;  %487 = vperm.xlu1 %1533, %v2046_v62  }
 0x1a0   :  { %778 = vst.msk [vmem:[#allocation2 + $0x48] sm:$0xff] %vm2801_vm0, %v2043_v60  ;;  %770 = vst.msk [vmem:[#allocation2 + $0x8] sm:$0xff] %vm2801_vm0, %v2046_v62  ;;  %v423_v6 = vpop.xlane.xlu1 %422  ;;  %v417_v8 = vpop.xlane.xlu0 %416 }
 0x1a1   :  { %v2063_v10 = vmax.f32 %v2048_v1, %v423_v6  ;;  %v2066_v12 = vmax.f32 %v2055_v4, %v417_v8  ;;  %v2113_v6 = vld [vmem:[#allocation2 + $0x20] sm:$0xff] }
 0x1a2   :  { %2839 = vst [vmem:[#allocation26_spill] sm:$0xff] %v2113_v6 }
 0x1a3   :  { %2828 = vst [vmem:[#allocation15_spill] sm:$0xff] %v2063_v10  ;;  %2829 = vst [vmem:[#allocation16_spill] sm:$0xff] %v2066_v12  ;;  %482 = vperm.xlu0 %1534, %v2066_v12  }
 0x1a4   :  { %772 = vst.msk [vmem:[#allocation2 + $0x18] sm:$0xff] %vm2801_vm0, %v2063_v10  ;;  %769 = vst.msk [vmem:[#allocation2] sm:$0xff] %vm2801_vm0, %v2066_v12  ;;  %v439_v19 = vpop.xlane.xlu1 %438  ;;  %v433_v20 = vpop.xlane.xlu0 %432 }
 0x1a5   :  { %v2082_v22 = vmax.f32 %v2068_v13, %v439_v19  ;;  %v2085_v23 = vmax.f32 %v2074_v16, %v433_v20 }
 0x1a7   :  { %2832 = vst [vmem:[#allocation19_spill] sm:$0xff] %v2082_v22  ;;  %2833 = vst [vmem:[#allocation20_spill] sm:$0xff] %v2085_v23  ;;  %522 = vperm.xlu1 %1533, %v2085_v23   ;;  %537 = vperm.xlu0 %1534, %v2082_v22  }
 0x1a8   :  { %780 = vst.msk [vmem:[#allocation2 + $0x58] sm:$0xff] %vm2801_vm0, %v2082_v22  ;;  %777 = vst.msk [vmem:[#allocation2 + $0x40] sm:$0xff] %vm2801_vm0, %v2085_v23  ;;  %v421_v31 = vpop.xlane.xlu1 %420  ;;  %v437_v32 = vpop.xlane.xlu0 %436  ;;  %v2171_v22 = vld [vmem:[#allocation2 + $0x70] sm:$0xff] }
 0x1a9   :  { %v2102_v34 = vmax.f32 %v2087_v24, %v421_v31  ;;  %v2105_v35 = vmax.f32 %v2093_v27, %v437_v32  ;;  %v2123_v32 = vld [vmem:[#allocation2 + $0x68] sm:$0xff]  ;;  %2851 = vst [vmem:[#allocation38_spill] sm:$0xff] %v2171_v22 }
 0x1aa   :  { %2841 = vst [vmem:[#allocation28_spill] sm:$0xff] %v2123_v32 }
 0x1ab   :  { %2836 = vst [vmem:[#allocation23_spill] sm:$0xff] %v2102_v34  ;;  %2837 = vst [vmem:[#allocation24_spill] sm:$0xff] %v2105_v35  ;;  %497 = vperm.xlu1 %1533, %v2063_v10  }
 0x1ac   :  { %771 = vst.msk [vmem:[#allocation2 + $0x10] sm:$0xff] %vm2801_vm0, %v2102_v34  ;;  %779 = vst.msk [vmem:[#allocation2 + $0x50] sm:$0xff] %vm2801_vm0, %v2105_v35  ;;  %v427_v19 = vpop.xlane.xlu1 %426  ;;  %v425_v31 = vpop.xlane.xlu0 %424 }
 0x1ad   :  { %v2121_v20 = vmax.f32 %v2107_v58, %v427_v19  ;;  %v2126_v26 = vmax.f32 %v2113_v6, %v425_v31  ;;  %v2152_v19 = vld [vmem:[#allocation2 + $0x30] sm:$0xff] }
 0x1ae   :  { %2847 = vst [vmem:[#allocation34_spill] sm:$0xff] %v2152_v19 }
 0x1af   :  { %2840 = vst [vmem:[#allocation27_spill] sm:$0xff] %v2121_v20  ;;  %2842 = vst [vmem:[#allocation29_spill] sm:$0xff] %v2126_v26  ;;  %492 = vperm.xlu1 %1533, %v2102_v34  }
 0x1b0   :  { %774 = vst.msk [vmem:[#allocation2 + $0x28] sm:$0xff] %vm2801_vm0, %v2121_v20  ;;  %v443_v2 = vpop.xlane.xlu1 %442  ;;  %773 = vst.msk [vmem:[#allocation2 + $0x20] sm:$0xff] %vm2801_vm0, %v2126_v26  ;;  %v441_v8 = vpop.xlane.xlu0 %440 }
 0x1b1   :  { %v2140_v31 = vmax.f32 %v2123_v32, %v443_v2  ;;  %v2145_v14 = vmax.f32 %v2132_v18, %v441_v8 }
 0x1b3   :  { %2844 = vst [vmem:[#allocation31_spill] sm:$0xff] %v2140_v31  ;;  %2846 = vst [vmem:[#allocation33_spill] sm:$0xff] %v2145_v14  ;;  %547 = vperm.xlu0 %1534, %v2140_v31   ;;  %532 = vperm.xlu1 %1533, %v2105_v35  }
 0x1b4   :  { %782 = vst.msk [vmem:[#allocation2 + $0x68] sm:$0xff] %vm2801_vm0, %v2140_v31  ;;  %v431_v2 = vpop.xlane.xlu1 %430  ;;  %781 = vst.msk [vmem:[#allocation2 + $0x60] sm:$0xff] %vm2801_vm0, %v2145_v14  ;;  %v429_v29 = vpop.xlane.xlu0 %428 }
 0x1b5   :  { %v2160_v8 = vmax.f32 %v2142_v61, %v431_v2  ;;  %v2165_v50 = vmax.f32 %v2152_v19, %v429_v29  ;;  %v786_v2 = vld [vmem:[%s2779_s2 + $0x8] sm:$0xff] }
 0x1b7   :  { %2848 = vst [vmem:[#allocation35_spill] sm:$0xff] %v2160_v8  ;;  %2850 = vst [vmem:[#allocation37_spill] sm:$0xff] %v2165_v50  ;;  %507 = vperm.xlu1 %1533, %v2121_v20  }
 0x1b8   :  { %776 = vst.msk [vmem:[#allocation2 + $0x38] sm:$0xff] %vm2801_vm0, %v2160_v8  ;;  %v447_v5 = vpop.xlane.xlu1 %446  ;;  %775 = vst.msk [vmem:[#allocation2 + $0x30] sm:$0xff] %vm2801_vm0, %v2165_v50  ;;  %v445_v13 = vpop.xlane.xlu0 %444 }
 0x1b9   :  { %v2179_v29 = vmax.f32 %v2162_v49, %v447_v5  ;;  %v2182_v58 = vmax.f32 %v2171_v22, %v445_v13  ;;  %v2854_v5 = vlaneseq }
 0x1bb   :  { %2852 = vst [vmem:[#allocation39_spill] sm:$0xff] %v2179_v29  ;;  %2853 = vst [vmem:[#allocation40_spill] sm:$0xff] %v2182_v58  ;;  %557 = vperm.xlu0 %1534, %v2179_v29   ;;  %502 = vperm.xlu1 %1533, %v2126_v26   ;;  %v2198_v13 = vshrl.u32 %v2854_v5, 7 }
 0x1bc   :  { %784 = vst.msk [vmem:[#allocation2 + $0x78] sm:$0xff] %vm2801_vm0, %v2179_v29  ;;  %783 = vst.msk [vmem:[#allocation2 + $0x70] sm:$0xff] %vm2801_vm0, %v2182_v58 }
 0x1bd   :  { %v297_v61 = vadd.s32 16, %v2198_v13  ;;  %v299_v22 = vadd.s32 32, %v2198_v13  ;;  %v301_v5 = vadd.s32 48, %v2198_v13  ;;  %v298_v60 = vadd.s32 24, %v2198_v13 }
 0x1be   :  { %v296_v35 = vadd.s32 8, %v2198_v13 }
 0x1bf   :  { %542 = vperm.xlu1 %1533, %v2145_v14   ;;  %vm336_vm2 = vcmp.ne.s32.totalorder %v297_v61, %v1925_v51  ;;  %vm338_vm4 = vcmp.ne.s32.totalorder %v299_v22, %v1925_v51  ;;  %vm340_vm7 = vcmp.ne.s32.totalorder %v301_v5, %v1925_v51  ;;  %v303_v22 = vadd.s32 64, %v2198_v13 }
 0x1c0   :  { %vm2209_vm3 = vmand %vm333_vm1, %vm336_vm2  ;;  %v305_v5 = vadd.s32 80, %v2198_v13  ;;  %v2876_v14 = vmov 0 }
 0x1c1   :  { %vm2227_vm6 = vmand %vm333_vm1, %vm338_vm4  ;;  %vm342_vm10 = vcmp.ne.s32.totalorder %v303_v22, %v1925_v51 }
 0x1c2   :  { %vm2243_vm9 = vmand %vm333_vm1, %vm340_vm7  ;;  %vm344_vm13 = vcmp.ne.s32.totalorder %v305_v5, %v1925_v51  ;;  %v309_v5 = vadd.s32 112, %v2198_v13 }
 0x1c3   :  { %517 = vperm.xlu1 %1533, %v2160_v8   ;;  %vm2259_vm12 = vmand %vm333_vm1, %vm342_vm10  ;;  %vm337_vm10 = vcmp.ne.s32.totalorder %v298_v60, %v1925_v51 }
 0x1c4   :  { %vm2275_vm15 = vmand %vm333_vm1, %vm344_vm13  ;;  %vm348_vm7 = vcmp.ne.s32.totalorder %v309_v5, %v1925_v51  ;;  %vm334_vm13 = vcmp.ne.s32.totalorder %v2198_v13, %v1925_v51 }
 0x1c7   :  { %512 = vperm.xlu1 %1533, %v2165_v50   ;;  %v2868_v50 = vmov 0 }
 0x1cb   :  { %552 = vperm.xlu1 %1533, %v2182_v58   ;;  %v2218_v58 = vld [vmem:[%s2780_s3] ss:$0 sm:$0xff] }
 0x1cc   :  { %vm856_vm5 = vcmp.eq.s32.totalorder %v2008_v36, %v2218_v58  ;;  %vm858_vm8 = vcmp.eq.s32.totalorder %v2012_v38, %v2218_v58  ;;  %vm860_vm11 = vcmp.eq.s32.totalorder %v2014_v39, %v2218_v58  ;;  %vm862_vm14 = vcmp.eq.s32.totalorder %v2018_v41, %v2218_v58 }
 0x1cd   :  { %vm864_vm4 = vcmp.eq.s32.totalorder %v2022_v43, %v2218_v58 }
 0x1cf   :  { %806 = vperm.xlu1 %1533, %v786_v2   ;;  %v2857_v2 = vmov 0.0  }
 0x1d0   :  { %v1392_v61 = vsel %vm2209_vm3, 1.0, %v2857_v2  ;;  %v1394_v1 = vsel %vm2227_vm6, 1.0, %v2857_v2  ;;  %v1396_v38 = vsel %vm2243_vm9, 1.0, %v2857_v2  ;;  %v1398_v39 = vsel %vm2259_vm12, 1.0, %v2857_v2 }
 0x1d1   :  { %v2233_v10 = vsel %vm856_vm5, %v1392_v61, 0.0  ;;  %v2249_v61 = vsel %vm858_vm8, %v1394_v1, 0.0  ;;  %v307_v1 = vadd.s32 96, %v2198_v13  ;;  %v2265_v22 = vsel %vm860_vm11, %v1396_v38, 0.0  ;;  %vm2309_vm11 = vmand %vm333_vm1, %vm348_vm7 }
 0x1d2   :  { %v2281_v38 = vsel %vm862_vm14, %v1398_v39, 0.0  ;;  %v1400_v41 = vsel %vm2275_vm15, 1.0, %v2857_v2  ;;  %vm866_vm8 = vcmp.eq.s32.totalorder %v2026_v45, %v2218_v58  ;;  %v300_v39 = vadd.s32 40, %v2198_v13  ;;  %vm2319_vm14 = vmand %vm333_vm1, %vm337_vm10 }
 0x1d3   :  { %vm346_vm2 = vcmp.ne.s32.totalorder %v307_v1, %v1925_v51  ;;  %v2297_v1 = vsel %vm864_vm4, %v1400_v41, 0.0  ;;  %v2869_v50 = vsel %vm2309_vm11, 4294967295, %v2868_v50  ;;  %v1404_v60 = vsel %vm2309_vm11, 1.0, %v2857_v2  ;;  %vm2333_vm7 = vmand %vm333_vm1, %vm334_vm13 }
 0x1d4   :  { %vm2292_vm5 = vmand %vm333_vm1, %vm346_vm2  ;;  %vm868_vm2 = vcmp.eq.s32.totalorder %v2030_v47, %v2218_v58  ;;  %vm339_vm4 = vcmp.ne.s32.totalorder %v300_v39, %v1925_v51  ;;  %v302_v41 = vadd.s32 56, %v2198_v13  ;;  %v1393_v47 = vsel %vm2319_vm14, 1.0, %v2857_v2 }
 0x1d5   :  { %v1402_v43 = vsel %vm2292_vm5, 1.0, %v2857_v2  ;;  %v2342_v19 = vsel %vm868_vm2, %v1404_v60, 0.0  ;;  %vm2346_vm10 = vmand %vm333_vm1, %vm339_vm4  ;;  %v2874_v39 = vmov 0  ;;  %vm854_vm13 = vcmp.eq.s32.totalorder %v2036_v53, %v2218_v58 }
 0x1d6   :  { %v2315_v45 = vsel %vm866_vm8, %v1402_v43, 0.0  ;;  %vm857_vm8 = vcmp.eq.s32.totalorder %v2010_v37, %v2218_v58  ;;  %v2875_v39 = vsel %vm2346_vm10, 4294967295, %v2874_v39  ;;  %v1390_v37 = vsel %vm2333_vm7, 1.0, %v2857_v2 }
 0x1d7   :  { %vm341_vm0 = vcmp.ne.s32.totalorder %v302_v41, %v1925_v51  ;;  %v304_v60 = vadd.s32 72, %v2198_v13  ;;  %v2358_v29 = vsel %vm857_vm8, %v1393_v47, 0.0  ;;  %vm859_vm2 = vcmp.eq.s32.totalorder %v2016_v40, %v2218_v58 }
 0x1d8   :  { %v1395_v53 = vsel %vm2346_vm10, 1.0, %v2857_v2  ;;  %v2366_v49 = vsel %vm854_vm13, %v1390_v37, 0.0  ;;  %vm2370_vm4 = vmand %vm333_vm1, %vm341_vm0  ;;  %v306_v40 = vadd.s32 88, %v2198_v13  ;;  %vm861_vm11 = vcmp.eq.s32.totalorder %v2020_v42, %v2218_v58 }
 0x1d9   :  { %v2877_v14 = vsel %vm2370_vm4, 4294967295, %v2876_v14  ;;  %vm343_vm8 = vcmp.ne.s32.totalorder %v304_v60, %v1925_v51  ;;  %v2377_v41 = vsel %vm859_vm2, %v1395_v53, 0.0  ;;  %v904_v47 = vmul.f32 %v2233_v10, %v1957_v9  ;;  %v984_v60 = vld [vmem:[#allocation5 + $0x10] sm:$0xff] }
 0x1da   :  { %1002 = vadd.xlane.f32.xlu0 %v2233_v10  ;;  %v1397_v37 = vsel %vm2370_vm4, 1.0, %v2857_v2  ;;  %vm2389_vm0 = vmand %vm333_vm1, %vm343_vm8  ;;  %vm345_vm13 = vcmp.ne.s32.totalorder %v306_v40, %v1925_v51  ;;  %v308_v42 = vadd.s32 104, %v2198_v13  ;;  %vm863_vm2 = vcmp.eq.s32.totalorder %v2024_v44, %v2218_v58 }
 0x1db   :  { %v2395_v53 = vsel %vm861_vm11, %v1397_v37, 0.0  ;;  %v906_v10 = vmul.f32 %v2249_v61, %v1967_v15  ;;  %v1399_v18 = vsel %vm2389_vm0, 1.0, %v2857_v2  ;;  %vm2407_vm8 = vmand %vm333_vm1, %vm345_vm13  ;;  %v2880_v40 = vmov 0 }
 0x1dc   :  { %v2881_v40 = vsel %vm2407_vm8, 4294967295, %v2880_v40  ;;  %vm347_vm11 = vcmp.ne.s32.totalorder %v308_v42, %v1925_v51  ;;  %v310_v44 = vadd.s32 120, %v2198_v13  ;;  %vm865_vm4 = vcmp.eq.s32.totalorder %v2028_v46, %v2218_v58 }
 0x1dd   :  { %vm2423_vm13 = vmand %vm333_vm1, %vm347_vm11 }
 0x1de   :  { %1006 = vadd.xlane.f32.xlu0 %v2249_v61  ;;  %v1401_v61 = vsel %vm2407_vm8, 1.0, %v2857_v2  ;;  %vm349_vm10 = vcmp.ne.s32.totalorder %v310_v44, %v1925_v51  ;;  %v1403_v46 = vsel %vm2423_vm13, 1.0, %v2857_v2 }
 0x1df   :  { %v2428_v42 = vsel %vm865_vm4, %v1401_v61, 0.0  ;;  %vm2438_vm8 = vmand %vm333_vm1, %vm349_vm10  ;;  %vm869_vm4 = vcmp.eq.s32.totalorder %v2034_v52, %v2218_v58  ;;  %vm335_vm10 = vcmp.ne.s32.totalorder %v296_v35, %v1925_v51 }
 0x1e0   :  { %vm2463_vm11 = vmand %vm333_vm1, %vm335_vm10 }
 0x1e2   :  { %1010 = vadd.xlane.f32.xlu0 %v2265_v22 }
 0x1e6   :  { %1014 = vadd.xlane.f32.xlu0 %v2281_v38 }
 0x1ea   :  { %1018 = vadd.xlane.f32.xlu0 %v2297_v1 }
 0x1ee   :  { %1022 = vadd.xlane.f32.xlu0 %v2315_v45 }
 0x1f2   :  { %1026 = vadd.xlane.f32.xlu0 %v2342_v19 }
 0x1f3   :  { %1004 = vadd.xlane.f32.xlu1 %v2358_v29 }
 0x1f6   :  { %998 = vadd.xlane.f32.xlu0 %v2366_v49 }
 0x1f7   :  { %1008 = vadd.xlane.f32.xlu1 %v2377_v41 }
 0x1fa   :  { %922 = vadd.xlane.f32.xlu0 %v904_v47  ;;  %v2413_v47 = vsel %vm863_vm2, %v1399_v18, 0.0  ;;  %vm867_vm2 = vcmp.eq.s32.totalorder %v2032_v48, %v2218_v58  ;;  %v1405_v48 = vsel %vm2438_vm8, 1.0, %v2857_v2 }
 0x1fb   :  { %1012 = vadd.xlane.f32.xlu1 %v2395_v53  ;;  %v2450_v44 = vsel %vm869_vm4, %v1405_v48, 0.0 }
 0x1fe   :  { %926 = vadd.xlane.f32.xlu0 %v906_v10  ;;  %v2442_v10 = vsel %vm867_vm2, %v1403_v46, 0.0 }
 0x1ff   :  { %1016 = vadd.xlane.f32.xlu1 %v2413_v47 }
 0x203   :  { %1020 = vadd.xlane.f32.xlu1 %v2428_v42 }
 0x207   :  { %1024 = vadd.xlane.f32.xlu1 %v2442_v10 }
 0x20b   :  { %1028 = vadd.xlane.f32.xlu1 %v2450_v44 }
 0x21a   :  { %v488_v61 = vpop.permute.xlu1 %487  ;;  %v528_v6 = vpop.permute.xlu0 %527 }
 0x21b   :  { %v561_v26 = vsub.f32 %v1928_v54, %v488_v61 }
 0x21d   :  { %v578_v31 = vmul.f32 1.442695, %v561_v26 }
 0x21e   :  { %v483_v32 = vpop.permute.xlu0 %482 }
 0x21f   :  { %1535 = vpow2.f32 %v578_v31 }
 0x222   :  { %v523_v46 = vpop.permute.xlu1 %522  ;;  %v2459_v48 = vpop.permute.xlu0 %537 }
 0x223   :  { %v568_v52 = vsub.f32 %v1947_v3, %v523_v46 }
 0x225   :  { %v592_v27 = vmul.f32 1.442695, %v568_v52 }
 0x226   :  { %v2456_v34 = vpop.permute.xlu1 %497 }
 0x227   :  { %1537 = vpow2.f32 %v592_v27  ;;  %v563_v4 = vsub.f32 %v1940_v63, %v2456_v34 }
 0x22a   :  { %v493_v24 = vpop.permute.xlu1 %492 }
 0x22b   :  { %v562_v31 = vsub.f32 %v1957_v9, %v493_v24 }
 0x22c   :  { %v1536_v61 = vpop.eup %1535 }
 0x22d   :  { %v580_v46 = vmul.f32 1.442695, %v562_v31  ;;  %v609_v13 = vsel %vm2463_vm11, %v1536_v61, 0.0 }
 0x22e   :  { %v548_v52 = vpop.permute.xlu0 %547  ;;  %v533_v27 = vpop.permute.xlu1 %532  ;;  %706 = vadd.xlane.f32.xlu0 %v609_v13 }
 0x22f   :  { %v573_v35 = vsub.f32 %v1972_v17, %v548_v52  ;;  %1539 = vpow2.f32 %v580_v46  ;;  %v570_v23 = vsub.f32 %v1955_v7, %v533_v27 }
 0x231   :  { %v596_v51 = vmul.f32 1.442695, %v570_v23  ;;  %v602_v16 = vmul.f32 1.442695, %v573_v35 }
 0x232   :  { %v2472_v62 = vpop.permute.xlu1 %507 }
 0x233   :  { %1541 = vpow2.f32 %v596_v51 }
 0x234   :  { %v1538_v57 = vpop.eup %1537  ;;  %1543 = vpow2.f32 %v602_v16 }
 0x235   :  { %v616_v9 = vsel %vm2259_vm12, %v1538_v57, 0.0 }
 0x236   :  { %v503_v24 = vpop.permute.xlu1 %502  ;;  %720 = vadd.xlane.f32.xlu0 %v616_v9  ;;  %v558_v31 = vpop.permute.xlu0 %557  ;;  %v569_v9 = vsub.f32 %v1930_v55, %v528_v6 }
 0x237   :  { %v564_v61 = vsub.f32 %v1967_v15, %v503_v24  ;;  %v575_v46 = vsub.f32 %v1992_v30, %v558_v31 }
 0x239   :  { %v584_v13 = vmul.f32 1.442695, %v564_v61  ;;  %v606_v35 = vmul.f32 1.442695, %v575_v46  ;;  %v560_v46 = vsub.f32 %v1935_v59, %v483_v32  ;;  %v1391_v32 = vsel %vm2463_vm11, 1.0, %v2857_v2 }
 0x23a   :  { %v543_v52 = vpop.permute.xlu1 %542  ;;  %v905_v2 = vmul.f32 %v2358_v29, %v1940_v63 }
 0x23b   :  { %1545 = vpow2.f32 %v584_v13  ;;  %v572_v23 = vsub.f32 %v1977_v21, %v543_v52  ;;  %v594_v13 = vmul.f32 1.442695, %v569_v9 }
 0x23c   :  { %v1540_v27 = vpop.eup %1539 }
 0x23d   :  { %v600_v51 = vmul.f32 1.442695, %v572_v23  ;;  %v610_v16 = vsel %vm2209_vm3, %v1540_v27, 0.0  ;;  %v576_v27 = vmul.f32 1.442695, %v560_v46  ;;  %vm2888_vm3 = vnez %v2881_v40 }
 0x23e   :  { %v518_v12 = vpop.permute.xlu1 %517  ;;  %708 = vadd.xlane.f32.xlu0 %v610_v16  ;;  %v571_v16 = vsub.f32 %v1942_v0, %v2459_v48 }
 0x23f   :  { %1547 = vpow2.f32 %v600_v51 }
 0x240   :  { %v1542_v57 = vpop.eup %1541  ;;  %1549 = vpow2.f32 %v606_v35  ;;  %v598_v26 = vmul.f32 1.442695, %v571_v16  ;;  %v992_v16 = vld [vmem:[#allocation5 + $0x50] sm:$0xff] }
 0x241   :  { %v618_v15 = vsel %vm2275_vm15, %v1542_v57, 0.0  ;;  %v1544_v24 = vpop.eup %1543  ;;  %v582_v57 = vmul.f32 1.442695, %v563_v4  ;;  %v988_v4 = vld [vmem:[#allocation5 + $0x30] sm:$0xff]  ;;  %vm2892_vm15 = vnez %v2877_v14 }
 0x242   :  { %v513_v31 = vpop.permute.xlu1 %512  ;;  %724 = vadd.xlane.f32.xlu0 %v618_v15  ;;  %v621_v52 = vsel %vm2423_vm13, %v1544_v24, 0.0  ;;  %v907_v15 = vmul.f32 %v2377_v41, %v1962_v11 }
 0x243   :  { %v566_v61 = vsub.f32 %v1990_v28, %v513_v31  ;;  %v567_v31 = vsub.f32 %v1985_v25, %v518_v12 }
 0x245   :  { %v588_v8 = vmul.f32 1.442695, %v566_v61  ;;  %v590_v29 = vmul.f32 1.442695, %v567_v31  ;;  %v987_v31 = vld [vmem:[#allocation5 + $0x28] sm:$0xff] }
 0x246   :  { %v553_v23 = vpop.permute.xlu1 %552  ;;  %730 = vadd.xlane.f32.xlu0 %v621_v52 }
 0x247   :  { %1551 = vpow2.f32 %v588_v8  ;;  %v574_v18 = vsub.f32 %v2000_v33, %v553_v23 }
 0x248   :  { %v1546_v6 = vpop.eup %1545  ;;  %1553 = vpow2.f32 %v594_v13  ;;  %v910_v13 = vmul.f32 %v2281_v38, %v1947_v3  ;;  %v914_v3 = vmul.f32 %v2315_v45, %v1977_v21  ;;  %v986_v38 = vld [vmem:[#allocation5 + $0x20] sm:$0xff] }
 0x249   :  { %v612_v35 = vsel %vm2227_vm6, %v1546_v6, 0.0  ;;  %1555 = vpow2.f32 %v576_v27  ;;  %v604_v12 = vmul.f32 1.442695, %v574_v18  ;;  %vm2889_vm6 = vcmask 7168  }
 0x24a   :  { %v807_v51 = vpop.permute.xlu1 %806  ;;  %712 = vadd.xlane.f32.xlu0 %v612_v35  ;;  %1557 = vpow2.f32 %v582_v57  ;;  %v916_v27 = vmul.f32 %v2342_v19, %v2000_v33  ;;  %vm2891_vm12 = vmmov %vm2889_vm6 }
 0x24b   :  { %vm855_vm1 = vcmp.eq.s32.totalorder %v807_v51, %v2218_v58  ;;  %v565_v58 = vsub.f32 %v1962_v11, %v2472_v62  ;;  %1559 = vpow2.f32 %v598_v26  ;;  %v908_v62 = vmul.f32 %v2265_v22, %v1990_v28  ;;  %v990_v51 = vld [vmem:[#allocation5 + $0x40] sm:$0xff] }
 0x24c   :  { %v1548_v37 = vpop.eup %1547  ;;  %v2498_v9 = vsel %vm855_vm1, %v1391_v32, 0.0  ;;  %v912_v22 = vmul.f32 %v2297_v1, %v1955_v7  ;;  %v902_v32 = vmul.f32 %v2366_v49, %v1935_v59  ;;  %v909_v49 = vmul.f32 %v2395_v53, %v1985_v25  ;;  %v994_v59 = vld [vmem:[#allocation5 + $0x60] sm:$0xff] }
 0x24d   :  { %1000 = vadd.xlane.f32.xlu1 %v2498_v9  ;;  %v620_v34 = vsel %vm2292_vm5, %v1548_v37, 0.0  ;;  %v1550_v20 = vpop.eup %1549  ;;  %v586_v24 = vmul.f32 1.442695, %v565_v58  ;;  %vm2893_vm5 = vmmov %vm2889_vm6  ;;  %v985_v58 = vld [vmem:[#allocation5 + $0x18] sm:$0xff]  ;;  %v982_v53 = vld [vmem:[#allocation5] sm:$0xff] }
 0x24e   :  { %728 = vadd.xlane.f32.xlu0 %v620_v34  ;;  %v623_v48 = vsel %vm2438_vm8, %v1550_v20, 0.0 }
 0x24f   :  { %1561 = vpow2.f32 %v586_v24 }
 0x250   :  { %1563 = vpow2.f32 %v590_v29  ;;  %v917_v29 = vmul.f32 %v2450_v44, %v1992_v30  ;;  %v993_v44 = vld [vmem:[#allocation5 + $0x58] sm:$0xff] }
 0x251   :  { %924 = vadd.xlane.f32.xlu1 %v905_v2  ;;  %1565 = vpow2.f32 %v604_v12  ;;  %v911_v2 = vmul.f32 %v2413_v47, %v1930_v55  ;;  %v915_v47 = vmul.f32 %v2442_v10, %v1972_v17  ;;  %v991_v10 = vld [vmem:[#allocation5 + $0x48] sm:$0xff] }
 0x252   :  { %734 = vadd.xlane.f32.xlu0 %v623_v48 }
 0x254   :  { %v1552_v56 = vpop.eup %1551 }
 0x255   :  { %v1554_v61 = vpop.eup %1553  ;;  %928 = vadd.xlane.f32.xlu1 %v907_v15  ;;  %v614_v63 = vsel %vm2243_vm9, %v1552_v56, 0.0  ;;  %vm2890_vm9 = vnez %v2875_v39  ;;  %v913_v15 = vmul.f32 %v2428_v42, %v1942_v0  ;;  %v989_v42 = vld [vmem:[#allocation5 + $0x38] sm:$0xff] }
 0x256   :  { %716 = vadd.xlane.f32.xlu0 %v614_v63  ;;  %v617_v11 = vsel %vm2389_vm0, %v1554_v61, 0.0  ;;  %v1556_v41 = vpop.eup %1555  ;;  %vm2896_vm0 = vmmov %vm2893_vm5  ;;  %v888_v63 = vld [vmem:[#allocation4 + $0x10] sm:$0xff] }
 0x257   :  { %v608_v36 = vsel %vm2333_vm7, %v1556_v41, 0.0  ;;  %v1558_v46 = vpop.eup %1557  ;;  %vm2895_vm7 = vmmov %vm2893_vm5  ;;  %v890_v41 = vld [vmem:[#allocation4 + $0x20] sm:$0xff] }
 0x258   :  { %v611_v28 = vsel %vm2319_vm14, %v1558_v46, 0.0  ;;  %v1560_v8 = vpop.eup %1559  ;;  %vm2894_vm14 = vnez %v2869_v50  ;;  %v996_v50 = vld [vmem:[#allocation5 + $0x70] sm:$0xff]  ;;  %vm2897_vm8 = vmmov %vm2896_vm0 }
 0x259   :  { %722 = vadd.xlane.f32.xlu1 %v617_v11  ;;  %v619_v23 = vsel %vm2888_vm3, %v1560_v8, 0.0  ;;  %vm2898_vm13 = vmmov %vm2896_vm0 }
 0x25a   :  { %930 = vadd.xlane.f32.xlu0 %v908_v62  ;;  %vm2899_vm2 = vmmov %vm2896_vm0 }
 0x25b   :  { %vm2900_vm4 = vmmov %vm2896_vm0 }
 0x25c   :  { %v1562_v6 = vpop.eup %1561  ;;  %vm2901_vm10 = vmmov %vm2896_vm0 }
 0x25d   :  { %704 = vadd.xlane.f32.xlu1 %v608_v36  ;;  %v613_v1 = vsel %vm2890_vm9, %v1562_v6, 0.0  ;;  %v1564_v40 = vpop.eup %1563  ;;  %vm2902_vm11 = vmmov %vm2896_vm0  ;;  %v903_v36 = vmul.f32 %v2498_v9, %v1928_v54 }
 0x25e   :  { %934 = vadd.xlane.f32.xlu0 %v910_v13  ;;  %v615_v35 = vsel %vm2892_vm15, %v1564_v40, 0.0  ;;  %v1566_v39 = vpop.eup %1565  ;;  %vm2903_vm1 = vmmov %vm2896_vm0  ;;  %v2916_v40 = vld [vmem:[#allocation23_spill] sm:$0xff] }
 0x25f   :  { %v622_v37 = vsel %vm2894_vm14, %v1566_v39, 0.0  ;;  %vm2904_vm3 = vmmov %vm2896_vm0  ;;  %v2919_v39 = vld [vmem:[#allocation24_spill] sm:$0xff] }
 0x260   :  { %vm2906_vm9 = vmmov %vm2896_vm0 }
 0x261   :  { %710 = vadd.xlane.f32.xlu1 %v611_v28  ;;  %vm2908_vm15 = vmmov %vm2896_vm0 }
 0x262   :  { %938 = vadd.xlane.f32.xlu0 %v912_v22  ;;  %vm2931_vm14 = vmmov %vm2896_vm0 }
 0x263   :  { %v1003_v52 = vpop.xlane.xlu0 %1002 }
 0x264   :  { %v1032_v43 = vadd.f32 %v1003_v52, %v984_v60  ;;  %v995_v60 = vld [vmem:[#allocation5 + $0x68] sm:$0xff] }
 0x265   :  { %726 = vadd.xlane.f32.xlu1 %v619_v23  ;;  %v2909_v23 = vld [vmem:[#allocation10_spill] sm:$0xff] }
 0x266   :  { %1048 = vst.msk [vmem:[#allocation5 + $0x10] sm:$0xff] %vm2889_vm6, %v1032_v43  ;;  %942 = vadd.xlane.f32.xlu0 %v914_v3  ;;  %vm2905_vm6 = vmmov %vm2896_vm0  ;;  %v997_v43 = vld [vmem:[#allocation5 + $0x78] sm:$0xff] }
 0x267   :  { %v1007_v5 = vpop.xlane.xlu0 %1006  ;;  %v2910_v3 = vld [vmem:[#allocation12_spill] sm:$0xff] }
 0x268   :  { %v1034_v7 = vadd.f32 %v1007_v5, %v986_v38  ;;  %v2911_v38 = vsub.f32 %v2909_v23, %v2910_v3  ;;  %v2912_v5 = vld [vmem:[#allocation18_spill] sm:$0xff]  ;;  %v628_v3 = vld [vmem:[#allocation3 + $0x20] sm:$0xff] }
 0x269   :  { %714 = vadd.xlane.f32.xlu1 %v613_v1 }
 0x26a   :  { %1050 = vst.msk [vmem:[#allocation5 + $0x20] sm:$0xff] %vm2891_vm12, %v1034_v7  ;;  %946 = vadd.xlane.f32.xlu0 %v916_v27  ;;  %vm2907_vm12 = vmmov %vm2896_vm0  ;;  %v658_v6 = vmul.f32 1.442695, %v2911_v38  ;;  %v2913_v7 = vld [vmem:[#allocation20_spill] sm:$0xff] }
 0x26b   :  { %v1011_v21 = vpop.xlane.xlu0 %1010  ;;  %v2914_v1 = vsub.f32 %v2912_v5, %v2913_v7  ;;  %v2943_v5 = vld [vmem:[#allocation16_spill] sm:$0xff] }
 0x26c   :  { %v1036_v45 = vadd.f32 %v1011_v21, %v988_v4  ;;  %1567 = vpow2.f32 %v658_v6  ;;  %v2915_v4 = vld [vmem:[#allocation21_spill] sm:$0xff]  ;;  %v2942_v6 = vld [vmem:[#allocation14_spill] sm:$0xff] }
 0x26d   :  { %718 = vadd.xlane.f32.xlu1 %v615_v35  ;;  %v672_v27 = vmul.f32 1.442695, %v2914_v1  ;;  %v2917_v21 = vsub.f32 %v2915_v4, %v2916_v40  ;;  %v2944_v7 = vsub.f32 %v2942_v6, %v2943_v5  ;;  %v892_v5 = vld [vmem:[#allocation4 + $0x30] sm:$0xff] }
 0x26e   :  { %1052 = vst.msk [vmem:[#allocation5 + $0x30] sm:$0xff] %vm2893_vm5, %v1036_v45  ;;  %918 = vadd.xlane.f32.xlu0 %v902_v32  ;;  %v625_v32 = vld [vmem:[#allocation3 + $0x8] sm:$0xff]  ;;  %vm2924_vm5 = vmmov %vm2896_vm0 }
 0x26f   :  { %v1015_v33 = vpop.xlane.xlu0 %1014  ;;  %1569 = vpow2.f32 %v672_v27  ;;  %v660_v45 = vmul.f32 1.442695, %v2917_v21  ;;  %v656_v1 = vmul.f32 1.442695, %v2944_v7 }
 0x270   :  { %v1038_v19 = vadd.f32 %v1015_v33, %v990_v51  ;;  %v2918_v51 = vld [vmem:[#allocation22_spill] sm:$0xff] }
 0x271   :  { %732 = vadd.xlane.f32.xlu1 %v622_v37  ;;  %v2920_v33 = vsub.f32 %v2918_v51, %v2919_v39  ;;  %1571 = vpow2.f32 %v660_v45 }
 0x272   :  { %1054 = vst.msk [vmem:[#allocation5 + $0x40] sm:$0xff] %vm2895_vm7, %v1038_v19  ;;  %vm2938_vm7 = vmmov %vm2896_vm0 }
 0x273   :  { %v1019_v14 = vpop.xlane.xlu0 %1018  ;;  %v676_v19 = vmul.f32 1.442695, %v2920_v33  ;;  %v983_v33 = vld [vmem:[#allocation5 + $0x8] sm:$0xff] }
 0x274   :  { %v1040_v57 = vadd.f32 %v1019_v14, %v992_v16 }
 0x275   :  { %932 = vadd.xlane.f32.xlu1 %v909_v49  ;;  %1573 = vpow2.f32 %v676_v19  ;;  %v2922_v49 = vld [vmem:[#allocation31_spill] sm:$0xff]  ;;  %v2946_v19 = vld [vmem:[#allocation13_spill] sm:$0xff] }
 0x276   :  { %1056 = vst.msk [vmem:[#allocation5 + $0x50] sm:$0xff] %vm2896_vm0, %v1040_v57  ;;  %v2921_v57 = vld [vmem:[#allocation28_spill] sm:$0xff] }
 0x277   :  { %v1023_v34 = vpop.xlane.xlu0 %1022 }
 0x278   :  { %v1042_v20 = vadd.f32 %v1023_v34, %v994_v59  ;;  %v2923_v59 = vsub.f32 %v2921_v57, %v2922_v49  ;;  %v2611_v57 = vld [vmem:[#allocation5 + $0x10] sm:$0xff] }
 0x279   :  { %936 = vadd.xlane.f32.xlu1 %v911_v2  ;;  %v1568_v35 = vpop.eup %1567  ;;  %v632_v2 = vld [vmem:[#allocation3 + $0x40] sm:$0xff] }
 0x27a   :  { %1058 = vst.msk [vmem:[#allocation5 + $0x60] sm:$0xff] %vm2897_vm8, %v1042_v20  ;;  %v689_v37 = vmul.f32 %v1568_v35, %v625_v32  ;;  %v682_v34 = vmul.f32 1.442695, %v2923_v59  ;;  %vm2945_vm8 = vmmov %vm2896_vm0  ;;  %v636_v32 = vld [vmem:[#allocation3 + $0x60] sm:$0xff] }
 0x27b   :  { %v1027_v26 = vpop.xlane.xlu0 %1026 }
 0x27c   :  { %v1044_v48 = vadd.f32 %v1027_v26, %v996_v50  ;;  %v1005_v25 = vpop.xlane.xlu1 %1004  ;;  %v1570_v20 = vpop.eup %1569  ;;  %1575 = vpow2.f32 %v682_v34  ;;  %v2925_v50 = vld [vmem:[#allocation26_spill] sm:$0xff]  ;;  %v2926_v26 = vld [vmem:[#allocation29_spill] sm:$0xff] }
 0x27d   :  { %v1033_v56 = vadd.f32 %v1005_v25, %v985_v58  ;;  %940 = vadd.xlane.f32.xlu1 %v913_v15  ;;  %v2927_v58 = vsub.f32 %v2925_v50, %v2926_v26  ;;  %v696_v15 = vmul.f32 %v1570_v20, %v632_v2 }
 0x27e   :  { %1060 = vst.msk [vmem:[#allocation5 + $0x70] sm:$0xff] %vm2898_vm13, %v1044_v48  ;;  %vm2949_vm13 = vmmov %vm2896_vm0 }
 0x27f   :  { %v999_v24 = vpop.xlane.xlu0 %998  ;;  %1049 = vst.msk [vmem:[#allocation5 + $0x18] sm:$0xff] %vm2899_vm2, %v1033_v56  ;;  %v664_v48 = vmul.f32 1.442695, %v2927_v58  ;;  %v2928_v56 = vld [vmem:[#allocation30_spill] sm:$0xff]  ;;  %v639_v58 = vld [vmem:[#allocation3 + $0x78] sm:$0xff]  ;;  %vm2953_vm2 = vmmov %vm2896_vm0 }
 0x280   :  { %v1030_v55 = vadd.f32 %v999_v24, %v982_v53  ;;  %v1009_v61 = vpop.xlane.xlu1 %1008  ;;  %v2929_v24 = vld [vmem:[#allocation33_spill] sm:$0xff] }
 0x281   :  { %v1035_v62 = vadd.f32 %v1009_v61, %v987_v31  ;;  %944 = vadd.xlane.f32.xlu1 %v915_v47  ;;  %1577 = vpow2.f32 %v664_v48  ;;  %v2930_v31 = vsub.f32 %v2928_v56, %v2929_v24  ;;  %v1572_v47 = vpop.eup %1571  ;;  %v626_v61 = vld [vmem:[#allocation3 + $0x10] sm:$0xff]  ;;  %v1227_v48 = vadd.f32 1e-12, %v2611_v57 }
 0x282   :  { %1046 = vst.msk [vmem:[#allocation5] sm:$0xff] %vm2900_vm4, %v1030_v55  ;;  %v2951_v56 = vld [vmem:[#allocation19_spill] sm:$0xff]  ;;  %vm2954_vm4 = vmmov %vm2896_vm0 }
 0x283   :  { %v923_v0 = vpop.xlane.xlu0 %922  ;;  %1051 = vst.msk [vmem:[#allocation5 + $0x28] sm:$0xff] %vm2901_vm10, %v1035_v62  ;;  %v680_v55 = vmul.f32 1.442695, %v2930_v31  ;;  %v2933_v62 = vld [vmem:[#allocation39_spill] sm:$0xff]  ;;  %vm2958_vm10 = vmmov %vm2896_vm0 }
 0x284   :  { %v952_v18 = vadd.f32 %v923_v0, %v888_v63  ;;  %v1013_v11 = vpop.xlane.xlu1 %1012  ;;  %v2932_v63 = vld [vmem:[#allocation36_spill] sm:$0xff] }
 0x285   :  { %v1037_v12 = vadd.f32 %v1013_v11, %v989_v42  ;;  %948 = vadd.xlane.f32.xlu1 %v917_v29  ;;  %v2934_v0 = vsub.f32 %v2932_v63, %v2933_v62  ;;  %1579 = vpow2.f32 %v680_v55  ;;  %v690_v29 = vmul.f32 %v1572_v47, %v626_v61 }
 0x286   :  { %968 = vst.msk [vmem:[#allocation4 + $0x10] sm:$0xff] %vm2902_vm11, %v952_v18  ;;  %v1574_v18 = vpop.eup %1573  ;;  %vm2959_vm11 = vmmov %vm2896_vm0 }
 0x287   :  { %v927_v17 = vpop.xlane.xlu0 %926  ;;  %1053 = vst.msk [vmem:[#allocation5 + $0x38] sm:$0xff] %vm2903_vm1, %v1037_v12  ;;  %v686_v42 = vmul.f32 1.442695, %v2934_v0  ;;  %v630_v0 = vld [vmem:[#allocation3 + $0x30] sm:$0xff]  ;;  %vm2963_vm1 = vmmov %vm2896_vm0 }
 0x288   :  { %v954_v13 = vadd.f32 %v927_v17, %v890_v41  ;;  %v1017_v46 = vpop.xlane.xlu1 %1016  ;;  %v634_v41 = vld [vmem:[#allocation3 + $0x50] sm:$0xff]  ;;  %v2935_v17 = vld [vmem:[#allocation34_spill] sm:$0xff] }
 0x289   :  { %v1039_v30 = vadd.f32 %v1017_v46, %v991_v10  ;;  %920 = vadd.xlane.f32.xlu1 %v903_v36  ;;  %1581 = vpow2.f32 %v686_v42  ;;  %v2936_v10 = vld [vmem:[#allocation37_spill] sm:$0xff]  ;;  %v698_v46 = vmul.f32 %v1574_v18, %v634_v41 }
 0x28a   :  { %970 = vst.msk [vmem:[#allocation4 + $0x20] sm:$0xff] %vm2904_vm3, %v954_v13  ;;  %v2937_v36 = vsub.f32 %v2935_v17, %v2936_v10  ;;  %v2955_v18 = vld [vmem:[#allocation25_spill] sm:$0xff]  ;;  %vm2964_vm3 = vmmov %vm2896_vm0 }
 0x28b   :  { %1055 = vst.msk [vmem:[#allocation5 + $0x48] sm:$0xff] %vm2905_vm6, %v1039_v30  ;;  %v1576_v30 = vpop.eup %1575  ;;  %vm2968_vm6 = vmmov %vm2896_vm0 }
 0x28c   :  { %v1021_v28 = vpop.xlane.xlu1 %1020  ;;  %v668_v13 = vmul.f32 1.442695, %v2937_v36 }
 0x28d   :  { %v1041_v22 = vadd.f32 %v1021_v28, %v993_v44  ;;  %v637_v28 = vld [vmem:[#allocation3 + $0x68] sm:$0xff] }
 0x28e   :  { %1583 = vpow2.f32 %v668_v13 }
 0x28f   :  { %1057 = vst.msk [vmem:[#allocation5 + $0x58] sm:$0xff] %vm2906_vm9, %v1041_v22  ;;  %vm2969_vm9 = vmmov %vm2896_vm0 }
 0x290   :  { %v1025_v8 = vpop.xlane.xlu1 %1024 }
 0x291   :  { %v1043_v52 = vadd.f32 %v1025_v8, %v995_v60  ;;  %v2939_v60 = vld [vmem:[#allocation9_spill] sm:$0xff]  ;;  %v2940_v8 = vld [vmem:[#allocation11_spill] sm:$0xff] }
 0x293   :  { %1059 = vst.msk [vmem:[#allocation5 + $0x68] sm:$0xff] %vm2907_vm12, %v1043_v52  ;;  %v2941_v52 = vsub.f32 %v2939_v60, %v2940_v8  ;;  %v624_v8 = vld [vmem:[#allocation3] sm:$0xff]  ;;  %vm2970_vm12 = vmmov %vm2896_vm0 }
 0x294   :  { %v1029_v54 = vpop.xlane.xlu1 %1028 }
 0x295   :  { %v1045_v9 = vadd.f32 %v1029_v54, %v997_v43  ;;  %v674_v43 = vmul.f32 1.442695, %v2941_v52  ;;  %v701_v54 = vmul.f32 %v1576_v30, %v637_v28  ;;  %v633_v30 = vld [vmem:[#allocation3 + $0x48] sm:$0xff] }
 0x297   :  { %1061 = vst.msk [vmem:[#allocation5 + $0x78] sm:$0xff] %vm2908_vm15, %v1045_v9  ;;  %v1578_v9 = vpop.eup %1577  ;;  %1585 = vpow2.f32 %v674_v43  ;;  %v2960_v43 = vld [vmem:[#allocation32_spill] sm:$0xff]  ;;  %vm2971_vm15 = vmmov %vm2896_vm0 }
 0x298   :  { %v692_v21 = vmul.f32 %v1578_v9, %v628_v3  ;;  %v1580_v45 = vpop.eup %1579  ;;  %v2630_v3 = vld [vmem:[#allocation5 + $0x20] sm:$0xff] }
 0x299   :  { %v700_v34 = vmul.f32 %v1580_v45, %v636_v32  ;;  %v1582_v20 = vpop.eup %1581  ;;  %v2635_v45 = vld [vmem:[#allocation5 + $0x50] sm:$0xff] }
 0x29a   :  { %v703_v47 = vmul.f32 %v1582_v20, %v639_v58  ;;  %v627_v58 = vld [vmem:[#allocation3 + $0x18] sm:$0xff] }
 0x29b   :  { %v1584_v61 = vpop.eup %1583 }
 0x2a4   :  { %v1586_v10 = vpop.eup %1585 }
 0x2a5   :  { %v697_v6 = vmul.f32 %v1586_v10, %v633_v30 }
 0x2b7   :  { %v707_v16 = vpop.xlane.xlu0 %706 }
 0x2b8   :  { %v737_v14 = vadd.f32 %v707_v16, %v689_v37  ;;  %v2947_v37 = vld [vmem:[#allocation15_spill] sm:$0xff] }
 0x2b9   :  { %v2948_v16 = vsub.f32 %v2946_v19, %v2947_v37  ;;  %v2965_v37 = vld [vmem:[#allocation38_spill] sm:$0xff] }
 0x2ba   :  { %754 = vst.msk [vmem:[#allocation3 + $0x8] sm:$0xff] %vm2924_vm5, %v737_v14  ;;  %vm2972_vm5 = vmmov %vm2896_vm0 }
 0x2bb   :  { %v662_v14 = vmul.f32 1.442695, %v2948_v16  ;;  %v2966_v16 = vld [vmem:[#allocation40_spill] sm:$0xff] }
 0x2bf   :  { %v721_v25 = vpop.xlane.xlu0 %720 }
 0x2c0   :  { %v744_v53 = vadd.f32 %v721_v25, %v696_v15  ;;  %v889_v25 = vld [vmem:[#allocation4 + $0x18] sm:$0xff] }
 0x2c2   :  { %761 = vst.msk [vmem:[#allocation3 + $0x40] sm:$0xff] %vm2931_vm14, %v744_v53  ;;  %v2950_v53 = vld [vmem:[#allocation17_spill] sm:$0xff]  ;;  %vm2973_vm14 = vmmov %vm2896_vm0 }
 0x2c3   :  { %v2952_v24 = vsub.f32 %v2950_v53, %v2951_v56 }
 0x2c5   :  { %v678_v31 = vmul.f32 1.442695, %v2952_v24 }
 0x2c7   :  { %v709_v11 = vpop.xlane.xlu0 %708 }
 0x2c8   :  { %v738_v12 = vadd.f32 %v709_v11, %v690_v29  ;;  %v891_v29 = vld [vmem:[#allocation4 + $0x28] sm:$0xff]  ;;  %v2956_v11 = vld [vmem:[#allocation27_spill] sm:$0xff] }
 0x2c9   :  { %v1089_v27 = vld [vmem:[#allocation3 + $0x40] sm:$0xff]  ;;  %v2957_v41 = vsub.f32 %v2955_v18, %v2956_v11 }
 0x2ca   :  { %755 = vst.msk [vmem:[#allocation3 + $0x10] sm:$0xff] %vm2938_vm7, %v738_v12  ;;  %v1105_v51 = vadd.f32 1e-12, %v1089_v27  ;;  %vm2974_vm7 = vmmov %vm2896_vm0 }
 0x2cb   :  { %v725_v44 = vpop.xlane.xlu0 %724  ;;  %v666_v12 = vmul.f32 1.442695, %v2957_v41  ;;  %v635_v41 = vld [vmem:[#allocation3 + $0x58] sm:$0xff] }
 0x2cc   :  { %v746_v22 = vadd.f32 %v725_v44, %v698_v46  ;;  %v694_v46 = vmul.f32 %v1584_v61, %v630_v0  ;;  %v2625_v44 = vld [vmem:[#allocation5 + $0x40] sm:$0xff]  ;;  %v2648_v0 = vld [vmem:[#allocation5 + $0x30] sm:$0xff] }
 0x2ce   :  { %763 = vst.msk [vmem:[#allocation3 + $0x50] sm:$0xff] %vm2896_vm0, %v746_v22 }
 0x2cf   :  { %v731_v23 = vpop.xlane.xlu0 %730 }
 0x2d0   :  { %v749_v38 = vadd.f32 %v731_v23, %v701_v54  ;;  %v2961_v54 = vld [vmem:[#allocation35_spill] sm:$0xff] }
 0x2d1   :  { %v1083_v4 = vld [vmem:[#allocation3 + $0x10] sm:$0xff]  ;;  %v2962_v9 = vsub.f32 %v2960_v43, %v2961_v54  ;;  %v898_v43 = vld [vmem:[#allocation4 + $0x60] sm:$0xff]  ;;  %v629_v54 = vld [vmem:[#allocation3 + $0x28] sm:$0xff] }
 0x2d2   :  { %v1099_v40 = vadd.f32 1e-12, %v1083_v4  ;;  %766 = vst.msk [vmem:[#allocation3 + $0x68] sm:$0xff] %vm2945_vm8, %v749_v38  ;;  %vm2975_vm8 = vmmov %vm2896_vm0 }
 0x2d3   :  { %v713_v35 = vpop.xlane.xlu0 %712  ;;  %v670_v23 = vmul.f32 1.442695, %v2962_v9 }
 0x2d4   :  { %1587 = vlog2.f32 %v1099_v40  ;;  %v740_v39 = vadd.f32 %v713_v35, %v692_v21  ;;  %v1067_v21 = vld [vmem:[#allocation2 + $0x10] sm:$0xff] }
 0x2d5   :  { %1589 = vpow2.f32 %v656_v1  ;;  %v1091_v49 = vld [vmem:[#allocation3 + $0x50] sm:$0xff]  ;;  %v1233_v1 = vadd.f32 1e-12, %v2625_v44 }
 0x2d6   :  { %757 = vst.msk [vmem:[#allocation3 + $0x20] sm:$0xff] %vm2949_vm13, %v740_v39  ;;  %v1001_v59 = vpop.xlane.xlu1 %1000  ;;  %v1107_v2 = vadd.f32 1e-12, %v1091_v49  ;;  %1591 = vlog2.f32 %v1105_v51  ;;  %v1229_v51 = vadd.f32 1e-12, %v2630_v3  ;;  %vm2976_vm13 = vmmov %vm2896_vm0 }
 0x2d7   :  { %v1031_v50 = vadd.f32 %v1001_v59, %v983_v33  ;;  %v729_v26 = vpop.xlane.xlu0 %728  ;;  %1593 = vpow2.f32 %v662_v14  ;;  %v2967_v14 = vsub.f32 %v2965_v37, %v2966_v16 }
 0x2d8   :  { %v748_v15 = vadd.f32 %v729_v26, %v700_v34  ;;  %1595 = vlog2.f32 %v1107_v2  ;;  %v894_v34 = vld [vmem:[#allocation4 + $0x40] sm:$0xff]  ;;  %v1235_v2 = vadd.f32 1e-12, %v2635_v45 }
 0x2d9   :  { %1047 = vst.msk [vmem:[#allocation5 + $0x8] sm:$0xff] %vm2953_vm2, %v1031_v50  ;;  %1597 = vrcp.f32 %v1227_v48  ;;  %v684_v49 = vmul.f32 1.442695, %v2967_v14  ;;  %v2645_v48 = vld [vmem:[#allocation5 + $0x60] sm:$0xff]  ;;  %v900_v14 = vld [vmem:[#allocation4 + $0x70] sm:$0xff]  ;;  %vm2977_vm2 = vmmov %vm2896_vm0 }
 0x2da   :  { %765 = vst.msk [vmem:[#allocation3 + $0x60] sm:$0xff] %vm2954_vm4, %v748_v15  ;;  %v925_v55 = vpop.xlane.xlu1 %924  ;;  %1599 = vpow2.f32 %v678_v31  ;;  %v1163_v15 = vld [vmem:[#allocation4 + $0x10] sm:$0xff]  ;;  %vm2978_vm4 = vmmov %vm2896_vm0 }
 0x2db   :  { %v953_v63 = vadd.f32 %v925_v55, %v889_v25  ;;  %v735_v62 = vpop.xlane.xlu0 %734 }
 0x2dc   :  { %v751_v42 = vadd.f32 %v735_v62, %v703_v47 }
 0x2dd   :  { %v1085_v17 = vld [vmem:[#allocation3 + $0x20] sm:$0xff]  ;;  %969 = vst.msk [vmem:[#allocation4 + $0x18] sm:$0xff] %vm2958_vm10, %v953_v63  ;;  %v896_v63 = vld [vmem:[#allocation4 + $0x50] sm:$0xff]  ;;  %vm2979_vm10 = vmmov %vm2896_vm0 }
 0x2de   :  { %v1101_v36 = vadd.f32 1e-12, %v1085_v17  ;;  %768 = vst.msk [vmem:[#allocation3 + $0x78] sm:$0xff] %vm2959_vm11, %v751_v42  ;;  %v929_v13 = vpop.xlane.xlu1 %928  ;;  %v1237_v42 = vadd.f32 1e-12, %v2645_v48  ;;  %vm2980_vm11 = vmmov %vm2896_vm0 }
 0x2df   :  { %v955_v28 = vadd.f32 %v929_v13, %v891_v29  ;;  %v717_v22 = vpop.xlane.xlu0 %716 }
 0x2e0   :  { %1601 = vlog2.f32 %v1101_v36  ;;  %v742_v60 = vadd.f32 %v717_v22, %v694_v46 }
 0x2e1   :  { %v1588_v52 = vpop.eup %1587  ;;  %1603 = vpow2.f32 %v666_v12  ;;  %v1093_v38 = vld [vmem:[#allocation3 + $0x60] sm:$0xff]  ;;  %971 = vst.msk [vmem:[#allocation4 + $0x28] sm:$0xff] %vm2963_vm1, %v955_v28  ;;  %vm2981_vm1 = vmmov %vm2896_vm0 }
 0x2e2   :  { %v1590_v7 = vpop.eup %1589  ;;  %v1118_v27 = vmul.f32 0.6931472, %v1588_v52  ;;  %v1109_v4 = vadd.f32 1e-12, %v1093_v38  ;;  %759 = vst.msk [vmem:[#allocation3 + $0x30] sm:$0xff] %vm2964_vm3, %v742_v60  ;;  %v723_v40 = vpop.xlane.xlu1 %722  ;;  %v1073_v12 = vld [vmem:[#allocation2 + $0x40] sm:$0xff]  ;;  %vm2982_vm3 = vmmov %vm2896_vm0 }
 0x2e3   :  { %v745_v35 = vadd.f32 %v723_v40, %v697_v6  ;;  %v931_v32 = vpop.xlane.xlu0 %930  ;;  %v1592_v19 = vpop.eup %1591  ;;  %v688_v59 = vmul.f32 %v1590_v7, %v624_v8  ;;  %v1075_v60 = vld [vmem:[#allocation2 + $0x50] sm:$0xff]  ;;  %v1231_v8 = vadd.f32 1e-12, %v2648_v0 }
 0x2e4   :  { %v1147_v39 = vadd.f32 %v1118_v27, %v1067_v21  ;;  %1605 = vlog2.f32 %v1109_v4  ;;  %v956_v33 = vadd.f32 %v931_v32, %v892_v5  ;;  %v1594_v20 = vpop.eup %1593  ;;  %v1130_v24 = vmul.f32 0.6931472, %v1592_v19 }
 0x2e5   :  { %1607 = vpow2.f32 %v670_v23  ;;  %762 = vst.msk [vmem:[#allocation3 + $0x48] sm:$0xff] %vm2968_vm6, %v745_v35  ;;  %v1596_v56 = vpop.eup %1595  ;;  %v2654_v23 = vld [vmem:[#allocation5] sm:$0xff]  ;;  %vm2983_vm6 = vmmov %vm2896_vm0 }
 0x2e6   :  { %1609 = vrcp.f32 %v1233_v1  ;;  %v1195_v50 = vmul.f32 %v2611_v57, %v1147_v39  ;;  %972 = vst.msk [vmem:[#allocation4 + $0x30] sm:$0xff] %vm2969_vm9, %v956_v33  ;;  %v705_v26 = vpop.xlane.xlu1 %704  ;;  %v1598_v47 = vpop.eup %1597  ;;  %v691_v57 = vmul.f32 %v1594_v20, %v627_v58  ;;  %v1134_v17 = vmul.f32 0.6931472, %v1596_v56  ;;  %v1069_v1 = vld [vmem:[#allocation2 + $0x20] sm:$0xff]  ;;  %vm2984_vm9 = vmmov %vm2896_vm0 }
 0x2e7   :  { %v736_v25 = vadd.f32 %v705_v26, %v688_v59  ;;  %v935_v53 = vpop.xlane.xlu0 %934  ;;  %1611 = vrcp.f32 %v1229_v51  ;;  %v1600_v62 = vpop.eup %1599  ;;  %v1153_v30 = vadd.f32 %v1130_v24, %v1073_v12  ;;  %v1225_v33 = vadd.f32 1e-12, %v2654_v23  ;;  %v1094_v59 = vld [vmem:[#allocation3 + $0x68] sm:$0xff]  ;;  %v1077_v58 = vld [vmem:[#allocation2 + $0x60] sm:$0xff] }
 0x2e8   :  { %v1211_v31 = vsub.f32 %v1163_v15, %v1195_v50  ;;  %v958_v55 = vadd.f32 %v935_v53, %v894_v34  ;;  %1613 = vpow2.f32 %v684_v49  ;;  %v699_v52 = vmul.f32 %v1600_v62, %v635_v41  ;;  %v631_v50 = vld [vmem:[#allocation3 + $0x38] sm:$0xff]  ;;  %v1165_v15 = vld [vmem:[#allocation4 + $0x20] sm:$0xff] }
 0x2e9   :  { %v1087_v61 = vld [vmem:[#allocation3 + $0x30] sm:$0xff]  ;;  %753 = vst.msk [vmem:[#allocation3] sm:$0xff] %vm2970_vm12, %v736_v25  ;;  %1615 = vrcp.f32 %v1235_v2  ;;  %v1155_v27 = vadd.f32 %v1134_v17, %v1075_v60  ;;  %v1201_v32 = vmul.f32 %v2625_v44, %v1153_v30  ;;  %vm2985_vm12 = vmmov %vm2896_vm0 }
 0x2ea   :  { %v1259_v29 = vmul.f32 %v1598_v47, %v1211_v31  ;;  %v1103_v18 = vadd.f32 1e-12, %v1087_v61  ;;  %974 = vst.msk [vmem:[#allocation4 + $0x40] sm:$0xff] %vm2971_vm15, %v958_v55  ;;  %v711_v11 = vpop.xlane.xlu1 %710  ;;  %vm2986_vm15 = vmmov %vm2896_vm0 }
 0x2eb   :  { %v739_v10 = vadd.f32 %v711_v11, %v691_v57  ;;  %v939_v36 = vpop.xlane.xlu0 %938  ;;  %v1203_v25 = vmul.f32 %v2635_v45, %v1155_v27  ;;  %v1110_v57 = vadd.f32 1e-12, %v1094_v59  ;;  %v2668_v11 = vld [vmem:[#allocation5 + $0x18] sm:$0xff]  ;;  %v1082_v59 = vld [vmem:[#allocation3 + $0x8] sm:$0xff] }
 0x2ec   :  { %v1339_v13 = vmul.f32 -1.0, %v1259_v29  ;;  %1617 = vlog2.f32 %v1103_v18  ;;  %v1090_v46 = vld [vmem:[#allocation3 + $0x48] sm:$0xff]  ;;  %v960_v28 = vadd.f32 %v939_v36, %v896_v63  ;;  %v886_v29 = vld [vmem:[#allocation4] sm:$0xff] }
 0x2ed   :  { %v1602_v22 = vpop.eup %1601  ;;  %756 = vst.msk [vmem:[#allocation3 + $0x18] sm:$0xff] %vm2972_vm5, %v739_v10  ;;  %1619 = vrcp.f32 %v1237_v42  ;;  %v1106_v5 = vadd.f32 1e-12, %v1090_v46  ;;  %v638_v10 = vld [vmem:[#allocation3 + $0x70] sm:$0xff]  ;;  %vm2987_vm5 = vmmov %vm2896_vm0 }
 0x2ee   :  { %v1604_v9 = vpop.eup %1603  ;;  %v1355_v38 = vmul.f32 0.0, %v1339_v13  ;;  %v1122_v6 = vmul.f32 0.6931472, %v1602_v22  ;;  %976 = vst.msk [vmem:[#allocation4 + $0x50] sm:$0xff] %vm2973_vm14, %v960_v28  ;;  %v727_v7 = vpop.xlane.xlu1 %726  ;;  %1621 = vrcp.f32 %v1231_v8  ;;  %vm2988_vm14 = vmmov %vm2896_vm0 }
 0x2ef   :  { %v747_v4 = vadd.f32 %v727_v7, %v699_v52  ;;  %v943_v40 = vpop.xlane.xlu0 %942  ;;  %v693_v16 = vmul.f32 %v1604_v9, %v629_v54  ;;  %1623 = vlog2.f32 %v1106_v5  ;;  %v1228_v54 = vadd.f32 1e-12, %v2668_v11  ;;  %v1096_v9 = vld [vmem:[#allocation3 + $0x78] sm:$0xff]  ;;  %v2674_v7 = vld [vmem:[#allocation5 + $0x48] sm:$0xff] }
 0x2f0   :  { %1371 = vst.msk [vmem:[%s2781_s4 + $0x10] sm:$0xff] %vm2974_vm7, %v1355_v38  ;;  %v1149_v21 = vadd.f32 %v1122_v6, %v1069_v1  ;;  %v1081_v35 = vld [vmem:[#allocation3] sm:$0xff]  ;;  %v962_v51 = vadd.f32 %v943_v40, %v898_v43  ;;  %vm2989_vm7 = vmmov %vm2896_vm0 }
 0x2f1   :  { %v1606_v39 = vpop.eup %1605  ;;  %v1097_v19 = vadd.f32 1e-12, %v1081_v35  ;;  %v1169_v37 = vld [vmem:[#allocation4 + $0x40] sm:$0xff]  ;;  %764 = vst.msk [vmem:[#allocation3 + $0x58] sm:$0xff] %vm2896_vm0, %v747_v4  ;;  %v1071_v35 = vld [vmem:[#allocation2 + $0x30] sm:$0xff] }
 0x2f2   :  { %v1608_v49 = vpop.eup %1607  ;;  %v1197_v34 = vmul.f32 %v2630_v3, %v1149_v21  ;;  %v1138_v20 = vmul.f32 0.6931472, %v1606_v39  ;;  %v1217_v2 = vsub.f32 %v1169_v37, %v1201_v32  ;;  %978 = vst.msk [vmem:[#allocation4 + $0x60] sm:$0xff] %vm2975_vm8, %v962_v51  ;;  %v715_v44 = vpop.xlane.xlu1 %714  ;;  %v2681_v32 = vld [vmem:[#allocation5 + $0x28] sm:$0xff]  ;;  %v1112_v39 = vadd.f32 1e-12, %v1096_v9  ;;  %vm2990_vm8 = vmmov %vm2896_vm0 }
 0x2f3   :  { %v1610_v26 = vpop.eup %1609  ;;  %1625 = vlog2.f32 %v1097_v19  ;;  %v741_v53 = vadd.f32 %v715_v44, %v693_v16  ;;  %v947_v56 = vpop.xlane.xlu0 %946  ;;  %v695_v42 = vmul.f32 %v1608_v49, %v631_v50  ;;  %v1234_v49 = vadd.f32 1e-12, %v2674_v7 }
 0x2f4   :  { %v1213_v24 = vsub.f32 %v1165_v15, %v1197_v34  ;;  %v1265_v31 = vmul.f32 %v1610_v26, %v1217_v2  ;;  %v1084_v55 = vld [vmem:[#allocation3 + $0x18] sm:$0xff]  ;;  %v1157_v47 = vadd.f32 %v1138_v20, %v1077_v58  ;;  %v964_v3 = vadd.f32 %v947_v56, %v900_v14  ;;  %v1612_v61 = vpop.eup %1611 }
 0x2f5   :  { %v1100_v63 = vadd.f32 1e-12, %v1084_v55  ;;  %v1171_v62 = vld [vmem:[#allocation4 + $0x50] sm:$0xff]  ;;  %758 = vst.msk [vmem:[#allocation3 + $0x28] sm:$0xff] %vm2976_vm13, %v741_v53  ;;  %v1614_v18 = vpop.eup %1613  ;;  %1627 = vrcp.f32 %v1225_v33  ;;  %v893_v14 = vld [vmem:[#allocation4 + $0x38] sm:$0xff]  ;;  %vm2991_vm13 = vmmov %vm2896_vm0 }
 0x2f6   :  { %v1261_v45 = vmul.f32 %v1612_v61, %v1213_v24  ;;  %v1345_v41 = vmul.f32 -1.0, %v1265_v31  ;;  %v1219_v12 = vsub.f32 %v1171_v62, %v1203_v25  ;;  %980 = vst.msk [vmem:[#allocation4 + $0x70] sm:$0xff] %vm2977_vm2, %v964_v3  ;;  %v719_v17 = vpop.xlane.xlu1 %718  ;;  %v1616_v36 = vpop.eup %1615  ;;  %v1205_v13 = vmul.f32 %v2645_v48, %v1157_v47  ;;  %v2695_v15 = vld [vmem:[#allocation5 + $0x58] sm:$0xff]  ;;  %v1167_v25 = vld [vmem:[#allocation4 + $0x30] sm:$0xff]  ;;  %v2699_v62 = vld [vmem:[#allocation5 + $0x68] sm:$0xff] }
 0x2f7   :  { %1629 = vlog2.f32 %v1100_v63  ;;  %v743_v46 = vadd.f32 %v719_v17, %v695_v42  ;;  %v919_v30 = vpop.xlane.xlu0 %918  ;;  %v702_v5 = vmul.f32 %v1614_v18, %v638_v10  ;;  %v1230_v2 = vadd.f32 1e-12, %v2681_v32  ;;  %vm2992_vm2 = vmmov %vm2896_vm0 }
 0x2f8   :  { %v1341_v28 = vmul.f32 -1.0, %v1261_v45  ;;  %v1361_v22 = vmul.f32 0.0, %v1345_v41  ;;  %v1267_v60 = vmul.f32 %v1616_v36, %v1219_v12  ;;  %v1092_v8 = vld [vmem:[#allocation3 + $0x58] sm:$0xff]  ;;  %v950_v52 = vadd.f32 %v919_v30, %v886_v29  ;;  %v1074_v41 = vld [vmem:[#allocation2 + $0x48] sm:$0xff] }
 0x2f9   :  { %v1618_v43 = vpop.eup %1617  ;;  %1631 = vlog2.f32 %v1110_v57  ;;  %v1108_v38 = vadd.f32 1e-12, %v1092_v8  ;;  %v1173_v6 = vld [vmem:[#allocation4 + $0x60] sm:$0xff]  ;;  %760 = vst.msk [vmem:[#allocation3 + $0x38] sm:$0xff] %vm2978_vm4, %v743_v46  ;;  %v1098_v24 = vadd.f32 1e-12, %v1082_v59  ;;  %vm2993_vm4 = vmmov %vm2896_vm0 }
 0x2fa   :  { %v1357_v48 = vmul.f32 0.0, %v1341_v28  ;;  %v1126_v1 = vmul.f32 0.6931472, %v1618_v43  ;;  %1377 = vst.msk [vmem:[%s2781_s4 + $0x40] sm:$0xff] %vm2979_vm10, %v1361_v22  ;;  %v1347_v27 = vmul.f32 -1.0, %v1267_v60  ;;  %v1221_v4 = vsub.f32 %v1173_v6, %v1205_v13  ;;  %v733_v40 = vpop.xlane.xlu1 %732  ;;  %v1620_v21 = vpop.eup %1619  ;;  %v1065_v57 = vld [vmem:[#allocation2] sm:$0xff]  ;;  %vm2994_vm10 = vmmov %vm2896_vm0 }
 0x2fb   :  { %966 = vst.msk [vmem:[#allocation4] sm:$0xff] %vm2980_vm11, %v950_v52  ;;  %1633 = vlog2.f32 %v1108_v38  ;;  %v750_v51 = vadd.f32 %v733_v40, %v702_v5  ;;  %v1622_v20 = vpop.eup %1621  ;;  %v1236_v63 = vadd.f32 1e-12, %v2695_v15  ;;  %v2705_v12 = vld [vmem:[#allocation5 + $0x38] sm:$0xff]  ;;  %v2707_v13 = vld [vmem:[#allocation5 + $0x70] sm:$0xff]  ;;  %vm2995_vm11 = vmmov %vm2896_vm0 }
 0x2fc   :  { %1373 = vst.msk [vmem:[%s2781_s4 + $0x20] sm:$0xff] %vm2981_vm1, %v1357_v48  ;;  %v1151_v33 = vadd.f32 %v1126_v1, %v1071_v35  ;;  %v1363_v19 = vmul.f32 0.0, %v1347_v27  ;;  %v1269_v37 = vmul.f32 %v1620_v21, %v1221_v4  ;;  %v1086_v16 = vld [vmem:[#allocation3 + $0x28] sm:$0xff]  ;;  %1635 = vrcp.f32 %v1228_v54  ;;  %v1624_v58 = vpop.eup %1623  ;;  %v897_v28 = vld [vmem:[#allocation4 + $0x58] sm:$0xff]  ;;  %vm2996_vm1 = vmmov %vm2896_vm0 }
 0x2fd   :  { %v1102_v34 = vadd.f32 1e-12, %v1086_v16  ;;  %767 = vst.msk [vmem:[#allocation3 + $0x70] sm:$0xff] %vm2982_vm3, %v750_v51  ;;  %v1132_v42 = vmul.f32 0.6931472, %v1624_v58  ;;  %v1068_v54 = vld [vmem:[#allocation2 + $0x18] sm:$0xff]  ;;  %vm2997_vm3 = vmmov %vm2896_vm0 }
 0x2fe   :  { %v1199_v44 = vmul.f32 %v2648_v0, %v1151_v33  ;;  %1379 = vst.msk [vmem:[%s2781_s4 + $0x50] sm:$0xff] %vm2983_vm6, %v1363_v19  ;;  %v1349_v50 = vmul.f32 -1.0, %v1269_v37  ;;  %v933_v26 = vpop.xlane.xlu1 %932  ;;  %v895_v0 = vld [vmem:[#allocation4 + $0x48] sm:$0xff]  ;;  %v1238_v22 = vadd.f32 1e-12, %v2699_v62  ;;  %v2713_v1 = vld [vmem:[#allocation5 + $0x78] sm:$0xff]  ;;  %vm2998_vm6 = vmmov %vm2896_vm0 }
 0x2ff   :  { %1637 = vlog2.f32 %v1102_v34  ;;  %v957_v53 = vadd.f32 %v933_v26, %v893_v14  ;;  %v1232_v9 = vadd.f32 1e-12, %v2705_v12  ;;  %v1154_v5 = vadd.f32 %v1132_v42, %v1074_v41  ;;  %v899_v35 = vld [vmem:[#allocation4 + $0x68] sm:$0xff]  ;;  %v1164_v14 = vld [vmem:[#allocation4 + $0x18] sm:$0xff] }
 0x300   :  { %v1626_v56 = vpop.eup %1625  ;;  %1639 = vlog2.f32 %v1112_v39  ;;  %v1215_v31 = vsub.f32 %v1167_v25, %v1199_v44  ;;  %v1365_v55 = vmul.f32 0.0, %v1349_v50  ;;  %v1088_v47 = vld [vmem:[#allocation3 + $0x38] sm:$0xff]  ;;  %v2720_v51 = vld [vmem:[#allocation5 + $0x8] sm:$0xff]  ;;  %v1240_v37 = vadd.f32 1e-12, %v2713_v1 }
 0x301   :  { %1641 = vrcp.f32 %v1234_v49  ;;  %v1114_v3 = vmul.f32 0.6931472, %v1626_v56  ;;  %v1104_v61 = vadd.f32 1e-12, %v1088_v47  ;;  %973 = vst.msk [vmem:[#allocation4 + $0x38] sm:$0xff] %vm2984_vm9, %v957_v53  ;;  %v1076_v34 = vld [vmem:[#allocation2 + $0x58] sm:$0xff]  ;;  %v1202_v44 = vmul.f32 %v2674_v7, %v1154_v5  ;;  %vm2999_vm9 = vmmov %vm2896_vm0 }
 0x302   :  { %1643 = vrcp.f32 %v1230_v2  ;;  %v1263_v29 = vmul.f32 %v1622_v20, %v1215_v31  ;;  %1381 = vst.msk [vmem:[%s2781_s4 + $0x60] sm:$0xff] %vm2985_vm12, %v1365_v55  ;;  %v937_v18 = vpop.xlane.xlu1 %936  ;;  %v1628_v45 = vpop.eup %1627  ;;  %v1161_v6 = vld [vmem:[#allocation4] sm:$0xff]  ;;  %v901_v53 = vld [vmem:[#allocation4 + $0x78] sm:$0xff]  ;;  %vm3000_vm12 = vmmov %vm2896_vm0 }
 0x303   :  { %1645 = vlog2.f32 %v1104_v61  ;;  %v1145_v17 = vadd.f32 %v1114_v3, %v1065_v57  ;;  %v959_v10 = vadd.f32 %v937_v18, %v895_v0  ;;  %v1070_v0 = vld [vmem:[#allocation2 + $0x28] sm:$0xff] }
 0x304   :  { %v1630_v36 = vpop.eup %1629  ;;  %1647 = vlog2.f32 %v1098_v24  ;;  %v1343_v46 = vmul.f32 -1.0, %v1263_v29  ;;  %v1095_v30 = vld [vmem:[#allocation3 + $0x70] sm:$0xff]  ;;  %v1078_v24 = vld [vmem:[#allocation2 + $0x68] sm:$0xff] }
 0x305   :  { %v1120_v60 = vmul.f32 0.6931472, %v1630_v36  ;;  %v1193_v8 = vmul.f32 %v2654_v23, %v1145_v17  ;;  %v1111_v52 = vadd.f32 1e-12, %v1095_v30  ;;  %975 = vst.msk [vmem:[#allocation4 + $0x48] sm:$0xff] %vm2986_vm15, %v959_v10  ;;  %1649 = vrcp.f32 %v1236_v63  ;;  %v887_v36 = vld [vmem:[#allocation4 + $0x8] sm:$0xff] }
 0x306   :  { %v1632_v43 = vpop.eup %1631  ;;  %v1359_v38 = vmul.f32 0.0, %v1343_v46  ;;  %v941_v48 = vpop.xlane.xlu1 %940  ;;  %v1239_v23 = vadd.f32 1e-12, %v2707_v13 }
 0x307   :  { %v1148_v27 = vadd.f32 %v1120_v60, %v1068_v54  ;;  %v1209_v4 = vsub.f32 %v1161_v6, %v1193_v8  ;;  %1651 = vlog2.f32 %v1111_v52  ;;  %v961_v40 = vadd.f32 %v941_v48, %v897_v28  ;;  %v1072_v8 = vld [vmem:[#allocation2 + $0x38] sm:$0xff]  ;;  %v1166_v52 = vld [vmem:[#allocation4 + $0x28] sm:$0xff] }
 0x308   :  { %v1634_v21 = vpop.eup %1633  ;;  %1375 = vst.msk [vmem:[%s2781_s4 + $0x30] sm:$0xff] %vm2987_vm5, %v1359_v38  ;;  %1653 = vrcp.f32 %v1238_v22  ;;  %v1140_v16 = vmul.f32 0.6931472, %v1632_v43  ;;  %v1080_v6 = vld [vmem:[#allocation2 + $0x78] sm:$0xff] }
 0x309   :  { %v1196_v39 = vmul.f32 %v2668_v11, %v1148_v27  ;;  %v1136_v33 = vmul.f32 0.6931472, %v1634_v21  ;;  %v1257_v19 = vmul.f32 %v1628_v45, %v1209_v4  ;;  %977 = vst.msk [vmem:[#allocation4 + $0x58] sm:$0xff] %vm2988_vm14, %v961_v40  ;;  %1655 = vrcp.f32 %v1232_v9  ;;  %v1636_v59 = vpop.eup %1635 }
 0x30a   :  { %v945_v49 = vpop.xlane.xlu1 %944  ;;  %v1226_v11 = vadd.f32 1e-12, %v2720_v51  ;;  %1657 = vrcp.f32 %v1239_v23  ;;  %v1158_v3 = vadd.f32 %v1140_v16, %v1078_v24  ;;  %v1168_v16 = vld [vmem:[#allocation4 + $0x38] sm:$0xff] }
 0x30b   :  { %v1212_v20 = vsub.f32 %v1164_v14, %v1196_v39  ;;  %v1337_v2 = vmul.f32 -1.0, %v1257_v19  ;;  %v963_v50 = vadd.f32 %v945_v49, %v899_v35  ;;  %v1156_v25 = vadd.f32 %v1136_v33, %v1076_v34 }
 0x30c   :  { %v1638_v26 = vpop.eup %1637  ;;  %v1170_v58 = vld [vmem:[#allocation4 + $0x48] sm:$0xff]  ;;  %1659 = vrcp.f32 %v1240_v37  ;;  %v1206_v54 = vmul.f32 %v2699_v62, %v1158_v3  ;;  %v1079_v37 = vld [vmem:[#allocation2 + $0x70] sm:$0xff] }
 0x30d   :  { %v1640_v56 = vpop.eup %1639  ;;  %v1260_v31 = vmul.f32 %v1636_v59, %v1212_v20  ;;  %v1124_v55 = vmul.f32 0.6931472, %v1638_v26  ;;  %1369 = vst.msk [vmem:[%s2781_s4] sm:$0xff] %vm2989_vm7, %v1337_v2  ;;  %v1218_v47 = vsub.f32 %v1170_v58, %v1202_v44  ;;  %1661 = vrcp.f32 %v1226_v11  ;;  %v1066_v59 = vld [vmem:[#allocation2 + $0x8] sm:$0xff] }
 0x30e   :  { %979 = vst.msk [vmem:[#allocation4 + $0x68] sm:$0xff] %vm2896_vm0, %v963_v50  ;;  %v1642_v7 = vpop.eup %1641  ;;  %v949_v61 = vpop.xlane.xlu1 %948  ;;  %v1144_v41 = vmul.f32 0.6931472, %v1640_v56  ;;  %v1204_v17 = vmul.f32 %v2695_v15, %v1156_v25 }
 0x30f   :  { %v1644_v57 = vpop.eup %1643  ;;  %v1340_v63 = vmul.f32 -1.0, %v1260_v31  ;;  %v1150_v42 = vadd.f32 %v1124_v55, %v1070_v0  ;;  %v1266_v29 = vmul.f32 %v1642_v7, %v1218_v47  ;;  %v965_v18 = vadd.f32 %v949_v61, %v901_v53  ;;  %v1175_v31 = vld [vmem:[#allocation4 + $0x70] sm:$0xff] }
 0x310   :  { %v1646_v45 = vpop.eup %1645  ;;  %v1172_v10 = vld [vmem:[#allocation4 + $0x58] sm:$0xff]  ;;  %v1160_v23 = vadd.f32 %v1144_v41, %v1080_v6 }
 0x311   :  { %v1648_v46 = vpop.eup %1647  ;;  %v1356_v30 = vmul.f32 0.0, %v1340_v63  ;;  %v1198_v28 = vmul.f32 %v2681_v32, %v1150_v42  ;;  %v1128_v22 = vmul.f32 0.6931472, %v1646_v45  ;;  %v1346_v60 = vmul.f32 -1.0, %v1266_v29  ;;  %981 = vst.msk [vmem:[#allocation4 + $0x78] sm:$0xff] %vm2990_vm8, %v965_v18 }
 0x312   :  { %v1220_v43 = vsub.f32 %v1172_v10, %v1204_v17  ;;  %v921_v9 = vpop.xlane.xlu1 %920  ;;  %v1650_v38 = vpop.eup %1649  ;;  %v1116_v4 = vmul.f32 0.6931472, %v1648_v46  ;;  %v1208_v11 = vmul.f32 %v2713_v1, %v1160_v23 }
 0x313   :  { %1372 = vst.msk [vmem:[%s2781_s4 + $0x18] sm:$0xff] %vm2991_vm13, %v1356_v30  ;;  %v1214_v15 = vsub.f32 %v1166_v52, %v1198_v28  ;;  %v1152_v5 = vadd.f32 %v1128_v22, %v1072_v8  ;;  %v1362_v32 = vmul.f32 0.0, %v1346_v60  ;;  %v951_v48 = vadd.f32 %v921_v9, %v887_v36 }
 0x314   :  { %v1652_v27 = vpop.eup %1651  ;;  %v1268_v40 = vmul.f32 %v1650_v38, %v1220_v43  ;;  %v1146_v50 = vadd.f32 %v1116_v4, %v1066_v59 }
 0x315   :  { %v1174_v21 = vld [vmem:[#allocation4 + $0x68] sm:$0xff]  ;;  %v1262_v35 = vmul.f32 %v1644_v57, %v1214_v15  ;;  %v1142_v39 = vmul.f32 0.6931472, %v1652_v27  ;;  %v1200_v62 = vmul.f32 %v2705_v12, %v1152_v5  ;;  %1378 = vst.msk [vmem:[%s2781_s4 + $0x48] sm:$0xff] %vm2992_vm2, %v1362_v32  ;;  %v1654_v19 = vpop.eup %1653 }
 0x316   :  { %v1222_v33 = vsub.f32 %v1174_v21, %v1206_v54  ;;  %967 = vst.msk [vmem:[#allocation4 + $0x8] sm:$0xff] %vm2993_vm4, %v951_v48  ;;  %v1348_v14 = vmul.f32 -1.0, %v1268_v40  ;;  %v1656_v49 = vpop.eup %1655  ;;  %v1194_v7 = vmul.f32 %v2720_v51, %v1146_v50 }
 0x317   :  { %v1342_v34 = vmul.f32 -1.0, %v1262_v35  ;;  %v1159_v20 = vadd.f32 %v1142_v39, %v1079_v37  ;;  %v1216_v2 = vsub.f32 %v1168_v16, %v1200_v62  ;;  %v1658_v24 = vpop.eup %1657 }
 0x318   :  { %v1270_v44 = vmul.f32 %v1654_v19, %v1222_v33  ;;  %v1364_v12 = vmul.f32 0.0, %v1348_v14  ;;  %v1176_v26 = vld [vmem:[#allocation4 + $0x78] sm:$0xff] }
 0x319   :  { %v1358_v58 = vmul.f32 0.0, %v1342_v34  ;;  %v1207_v25 = vmul.f32 %v2707_v13, %v1159_v20  ;;  %v1264_v53 = vmul.f32 %v1656_v49, %v1216_v2  ;;  %v1224_v55 = vsub.f32 %v1176_v26, %v1208_v11  ;;  %v1660_v47 = vpop.eup %1659 }
 0x31a   :  { %v1350_v56 = vmul.f32 -1.0, %v1270_v44  ;;  %1380 = vst.msk [vmem:[%s2781_s4 + $0x58] sm:$0xff] %vm2994_vm10, %v1364_v12  ;;  %v1662_v57 = vpop.eup %1661 }
 0x31b   :  { %1374 = vst.msk [vmem:[%s2781_s4 + $0x28] sm:$0xff] %vm2995_vm11, %v1358_v58  ;;  %v1223_v1 = vsub.f32 %v1175_v31, %v1207_v25  ;;  %v1344_v13 = vmul.f32 -1.0, %v1264_v53  ;;  %v1272_v3 = vmul.f32 %v1660_v47, %v1224_v55 }
 0x31c   :  { %v1366_v0 = vmul.f32 0.0, %v1350_v56 }
 0x31d   :  { %v1162_v61 = vld [vmem:[#allocation4 + $0x8] sm:$0xff]  ;;  %v1271_v63 = vmul.f32 %v1658_v24, %v1223_v1  ;;  %v1360_v42 = vmul.f32 0.0, %v1344_v13  ;;  %v1352_v51 = vmul.f32 -1.0, %v1272_v3 }
 0x31e   :  { %1382 = vst.msk [vmem:[%s2781_s4 + $0x68] sm:$0xff] %vm2996_vm1, %v1366_v0  ;;  %v1210_v29 = vsub.f32 %v1162_v61, %v1194_v7 }
 0x31f   :  { %v1351_v18 = vmul.f32 -1.0, %v1271_v63  ;;  %1376 = vst.msk [vmem:[%s2781_s4 + $0x38] sm:$0xff] %vm2997_vm3, %v1360_v42  ;;  %v1368_v41 = vmul.f32 0.0, %v1352_v51 }
 0x320   :  { %v1258_v45 = vmul.f32 %v1662_v57, %v1210_v29 }
 0x321   :  { %v1367_v17 = vmul.f32 0.0, %v1351_v18  ;;  %1384 = vst.msk [vmem:[%s2781_s4 + $0x78] sm:$0xff] %vm2998_vm6, %v1368_v41 }
 0x322   :  { %v1338_v10 = vmul.f32 -1.0, %v1258_v45 }
 0x323   :  { %1383 = vst.msk [vmem:[%s2781_s4 + $0x70] sm:$0xff] %vm2999_vm9, %v1367_v17 }
 0x324   :  { %1370 = vst.msk [vmem:[%s2781_s4 + $0x8] sm:$0xff] %vm3000_vm12, %v1338_v10 }
 0x325   :  { %1389 = vsyncpa [#allocation7], 1 }

</bundles_post_ra>
